<compile_context>
chip_gen: v5e
topology: v5e:2x2
jax: 0.10.0
libtpu: 0.0.40
codegen_flags: <defaults>
</compile_context>

<pallas_src>
import functools

import jax
import jax.numpy as jnp
from jax import lax
from jax.experimental import pallas as pl
from jax.experimental.pallas import tpu as pltpu


# ----------------------------------------------------------------------------
# Fused head kernel: one (batch, row-tile) block per grid step.
#   stage 1: ReLU of the (already conv1x1+BN'd, upsampled) activation into a
#            zero-framed VMEM scratch (only the frame is zeroed).
#   stage 2: 3x3 conv + BN + ReLU as nine K=mid MXU dots accumulated in f32.
#   stage 3: 1x1 conv + bias as an NT dot -> channels-first, lane-dense store.
# ----------------------------------------------------------------------------
def _fused_head_kernel(xt_ref, xm_ref, xb_ref,
                       w2_ref, s2_ref, b2_ref,
                       w3t_ref, b3_ref,
                       o_ref, fm1_scr, *, TH, Wo, mid):
    t = pl.program_id(1)
    t_last = pl.num_programs(1) - 1

    # --- stage 1: ReLU into the scratch; zero only the 1-px pad frame -------
    fm1_scr[:, 0:1, :] = jnp.zeros((TH + 2, 1, mid), fm1_scr.dtype)
    fm1_scr[:, Wo + 1:Wo + 2, :] = jnp.zeros((TH + 2, 1, mid), fm1_scr.dtype)

    fm1_scr[1:TH + 1, 1:Wo + 1, :] = jnp.maximum(
        xm_ref[0].astype(jnp.float32), 0.0)

    # Halo rows: real data inside the image, zeros (conv padding) at borders.
    top = jnp.maximum(xt_ref[0].astype(jnp.float32), 0.0)        # (1, Wo, mid)
    fm1_scr[0:1, 1:Wo + 1, :] = jnp.where(t > 0, top, 0.0)
    bot = jnp.maximum(xb_ref[0].astype(jnp.float32), 0.0)
    fm1_scr[TH + 1:TH + 2, 1:Wo + 1, :] = jnp.where(t < t_last, bot, 0.0)

    # --- stage 2: 3x3 conv as nine K=mid dots, f32 accumulation -------------
    acc = jnp.zeros((TH * Wo, mid), jnp.float32)
    k = 0
    for dy in range(3):
        for dx in range(3):
            slab = fm1_scr[dy:dy + TH, dx:dx + Wo, :].reshape(TH * Wo, mid)
            acc = acc + jnp.dot(slab.astype(jnp.bfloat16), w2_ref[k],
                                preferred_element_type=jnp.float32)
            k += 1
    f2 = jnp.maximum(acc * s2_ref[...] + b2_ref[...], 0.0)       # (P, mid)

    # --- stage 3: 1x1 conv + bias, emitted channels-first (lane-dense) ------
    # out_t[o, p] = sum_m w3t[o, m] * f2[p, m]   (NT matmul, no transposes)
    out_t = lax.dot_general(
        w3t_ref[...], f2.astype(jnp.bfloat16),
        dimension_numbers=(((1,), (1,)), ((), ())),
        preferred_element_type=jnp.float32)                      # (OPp, P)
    o_ref[0] = out_t + b3_ref[...]


def _pick_tile_rows(Ho, Wo, target_px=4096):
    """Largest divisor of Ho with tile <= target_px pixels and TH*Wo % 128 == 0."""
    target = max(1, target_px // max(Wo, 1))
    best = None
    for d in range(1, Ho + 1):
        if Ho % d == 0 and d <= target and (d * Wo) % 128 == 0:
            best = d
    return best if best is not None else Ho


def fused_head(z_up, params, tile_rows=None, target_px=4096):
    """z_up: (N, Ho, Wo, mid) bf16 = upsample(conv1x1+BN(x)).  Returns NCHW f32."""
    N, Ho, Wo, mid = z_up.shape
    OP = params["w3"].shape[1]
    OPp = ((OP + 7) // 8) * 8                 # pad out-channels to a sublane multiple

    TH = _pick_tile_rows(Ho, Wo, target_px) if tile_rows is None else tile_rows
    if Ho % TH != 0:
        raise ValueError(f"tile_rows={TH} must divide Ho={Ho}")
    if (TH * Wo) % 128 != 0 and TH != Ho:
        raise ValueError(f"tile_rows*Wo={TH * Wo} must be a multiple of 128 "
                         f"(or tile_rows == Ho)")
    T = Ho // TH

    # bf16 weights for the MXU; folded-BN affine and bias stay f32.
    w2 = params["w2"].reshape(9, mid, mid).astype(jnp.bfloat16)       # (9, mid, mid)
    s2 = params["bn2_scale"].reshape(1, mid).astype(jnp.float32)
    b2 = params["bn2_shift"].reshape(1, mid).astype(jnp.float32)
    w3t = jnp.zeros((OPp, mid), jnp.bfloat16).at[:OP].set(
        params["w3"].T.astype(jnp.bfloat16))                          # (OPp, mid)
    b3p = jnp.zeros((OPp, 1), jnp.float32).at[:OP, 0].set(
        params["b3"].astype(jnp.float32))                             # (OPp, 1)

    kernel = functools.partial(_fused_head_kernel, TH=TH, Wo=Wo, mid=mid)
    const2 = lambda n, t: (0, 0)
    const3 = lambda n, t: (0, 0, 0)

    out_flat = pl.pallas_call(
        kernel,
        out_shape=jax.ShapeDtypeStruct((N, OPp, Ho * Wo), jnp.float32),
        grid=(N, T),
        in_specs=[
            # top halo row (clamped at the image top; discarded via where at t==0)
            pl.BlockSpec((1, 1, Wo, mid),
                         lambda n, t: (n, jnp.maximum(t * TH - 1, 0), 0, 0)),
            # main TH rows
            pl.BlockSpec((1, TH, Wo, mid), lambda n, t: (n, t, 0, 0)),
            # bottom halo row (clamped at the image bottom)
            pl.BlockSpec((1, 1, Wo, mid),
                         lambda n, t: (n, jnp.minimum(t * TH + TH, Ho - 1), 0, 0)),
            pl.BlockSpec((9, mid, mid), const3),
            pl.BlockSpec((1, mid), const2),
            pl.BlockSpec((1, mid), const2),
            pl.BlockSpec((OPp, mid), const2),
            pl.BlockSpec((OPp, 1), const2),
        ],
        # Lane-dense output: channels-first, pixels flattened on the lane axis.
        out_specs=pl.BlockSpec((1, OPp, TH * Wo), lambda n, t: (n, 0, t)),
        scratch_shapes=[pltpu.VMEM((TH + 2, Wo + 2, mid), jnp.float32)],
        compiler_params=pltpu.CompilerParams(
            dimension_semantics=("parallel", "parallel"),
            vmem_limit_bytes=32 * 1024 * 1024),
    )(z_up, z_up, z_up, w2, s2, b2, w3t, b3p)

    # Free reshape + cheap channel slice (drops the OP->OPp padding).
    return out_flat.reshape(N, OPp, Ho, Wo)[:, :OP]


# ----------------------------------------------------------------------------
# Bilinear upsample (align_corners=True) as two interpolation matmuls (MXU).
# ----------------------------------------------------------------------------
def _interp_matrix(n_in, n_out):
    ratio = (n_in - 1) / max(n_out - 1, 1)
    pos = jnp.arange(n_out, dtype=jnp.float32) * ratio
    lo = jnp.clip(jnp.floor(pos).astype(jnp.int32), 0, n_in - 1)
    hi = jnp.minimum(lo + 1, n_in - 1)
    w = pos - lo.astype(jnp.float32)
    return ((1.0 - w)[:, None] * jax.nn.one_hot(lo, n_in, dtype=jnp.float32)
            + w[:, None] * jax.nn.one_hot(hi, n_in, dtype=jnp.float32))


def upsample_bilinear_align_corners(x, scale):
    # x: (N, H, W, C) -> (N, H*scale, W*scale, C); matches
    # F.interpolate(mode='bilinear', align_corners=True) for integer scale.
    N, H, W, C = x.shape
    Ho, Wo = H * scale, W * scale
    Ay = _interp_matrix(H, Ho)   # (Ho, H)
    Ax = _interp_matrix(W, Wo)   # (Wo, W)
    x = jnp.einsum('oh,nhwc->nowc', Ay, x, precision=lax.Precision.HIGHEST)
    x = jnp.einsum('pw,nowc->nopc', Ax, x, precision=lax.Precision.HIGHEST)
    return x


# ----------------------------------------------------------------------------
# Deterministic parameter init (mirrors __init__ shapes; synthetic values).
# ----------------------------------------------------------------------------
def init_params(key, in_planes, out_planes, is_aux=False):
    mid = 64 if is_aux else 32
    k = jax.random.split(key, 6)

    def kaiming_uniform(kk, shape, fan_in):
        bound = (6.0 / fan_in) ** 0.5  # kaiming_uniform_, a=0 -> sqrt(6/fan_in)
        return jax.random.uniform(kk, shape, jnp.float32, -bound, bound)

    eps = 1e-5
    gamma1 = 1.0 + 0.02 * jax.random.normal(k[3], (mid,), jnp.float32)
    gamma2 = 1.0 + 0.02 * jax.random.normal(k[4], (mid,), jnp.float32)
    inv_std = 1.0 / jnp.sqrt(1.0 + eps)  # running_mean=0, running_var=1

    return {
        "mid": mid,
        # conv weights stored channels-last: (Cin, Cout) and HWIO.
        "w1": kaiming_uniform(k[0], (in_planes, mid), in_planes * 1 * 1),
        "w2": kaiming_uniform(k[1], (3, 3, mid, mid), mid * 3 * 3),
        "w3": kaiming_uniform(k[2], (mid, out_planes), mid * 1 * 1),
        "b3": jnp.zeros((out_planes,), jnp.float32),
        # folded eval-mode BatchNorm: y = x * bn_scale + bn_shift
        "bn1_scale": gamma1 * inv_std,
        "bn1_shift": jnp.zeros((mid,), jnp.float32),
        "bn2_scale": gamma2 * inv_std,
        "bn2_shift": jnp.zeros((mid,), jnp.float32),
    }


# ----------------------------------------------------------------------------
# Full BaseNetHead forward (NCHW in / NCHW out).
# ----------------------------------------------------------------------------
def base_net_head_forward(x_nchw, params, scale, tile_rows=None, target_px=4096):
    # Hoisted 1x1 conv + folded BN (per-pixel affine commutes exactly with the
    # bilinear upsample, whose interpolation weights sum to 1).
    z = jnp.einsum('nchw,cm->nhwm', x_nchw.astype(jnp.float32), params["w1"],
                   precision=lax.Precision.HIGHEST)
    z = z * params["bn1_scale"] + params["bn1_shift"]              # (N, H, W, mid)
    if scale > 1:
        z = upsample_bilinear_align_corners(z, scale)              # (N, Ho, Wo, mid)
    out = fused_head(z.astype(jnp.bfloat16), params,
                     tile_rows=tile_rows, target_px=target_px)
    return out                                                     # (N, OP, Ho, Wo)


# ----------------------------------------------------------------------------
# Pure-JAX f32 reference (original op order) for validation.
# ----------------------------------------------------------------------------
def _reference_head_nhwc(x_up_f32, params):
    f1 = jnp.einsum('nhwc,cm->nhwm', x_up_f32, params["w1"],
                    precision=lax.Precision.HIGHEST)
    f1 = jnp.maximum(f1 * params["bn1_scale"] + params["bn1_shift"], 0.0)
    f1p = jnp.pad(f1, ((0, 0), (1, 1), (1, 1), (0, 0)))
    f2 = lax.conv_general_dilated(
        f1p, params["w2"], window_strides=(1, 1), padding='VALID',
        dimension_numbers=('NHWC', 'HWIO', 'NHWC'),
        precision=lax.Precision.HIGHEST)
    f2 = jnp.maximum(f2 * params["bn2_scale"] + params["bn2_shift"], 0.0)
    return jnp.einsum('nhwm,mo->nhwo', f2, params["w3"],
                      precision=lax.Precision.HIGHEST) + params["b3"]


if __name__ == "__main__":
    key = jax.random.PRNGKey(0)
    k_x, k_p = jax.random.split(key)

    N, in_planes, H, W = 2, 4, 16, 16
    out_planes = 3
    scale = 2
    tile_rows = 8   # 32 upsampled rows -> 4 row-tiles/image; exercises the halo paths

    x = jax.random.normal(k_x, (N, in_planes, H, W), jnp.float32)
    params = init_params(k_p, in_planes, out_planes, is_aux=False)

    fwd = jax.jit(functools.partial(base_net_head_forward, params=params,
                                    scale=scale, tile_rows=tile_rows))
    out = fwd(x)
    jax.block_until_ready(out)

    assert out.shape == (N, out_planes, H * scale, W * scale), out.shape
    assert bool(jnp.all(jnp.isfinite(out)))

    # Cross-check against a pure-JAX f32 reference using the original op order
    # (upsample -> conv1x1 -> BN -> ReLU -> conv3x3 -> BN -> ReLU -> conv1x1).
    # Loose tolerance covers the kernel's bf16 activations/weights (f32 accum).
    x_nhwc = jnp.transpose(x, (0, 2, 3, 1)).astype(jnp.float32)
    x_up = upsample_bilinear_align_corners(x_nhwc, scale)
    ref = jnp.transpose(_reference_head_nhwc(x_up, params), (0, 3, 1, 2))
    max_err = float(jnp.max(jnp.abs(out - ref)))
    assert max_err < 0.15, f"max abs error vs reference: {max_err}"

    print("KERNEL_OK")
</pallas_src>

<mosaic_0001>
module attributes {stable_mosaic.version = 11 : i64} {
  func.func @_fused_head_kernel(%arg0: i32, %arg1: i32, %arg2: memref<1x1x32x32xbf16, #tpu.memory_space<vmem>>, %arg3: memref<1x8x32x32xbf16, #tpu.memory_space<vmem>>, %arg4: memref<1x1x32x32xbf16, #tpu.memory_space<vmem>>, %arg5: memref<9x32x32xbf16, #tpu.memory_space<vmem>>, %arg6: memref<1x32xf32, #tpu.memory_space<vmem>>, %arg7: memref<1x32xf32, #tpu.memory_space<vmem>>, %arg8: memref<8x32xbf16, #tpu.memory_space<vmem>>, %arg9: memref<8x1xf32, #tpu.memory_space<vmem>>, %arg10: memref<1x8x256xf32, #tpu.memory_space<vmem>>, %arg11: memref<10x34x32xf32, #tpu.memory_space<vmem>>) attributes {dimension_semantics = [#tpu.dimension_semantics<parallel>, #tpu.dimension_semantics<parallel>], iteration_bounds = array<i64: 2, 4>, scalar_prefetch = 0 : i64, scratch_operands = 1 : i64, tpu.core_type = #tpu.core_type<tc>, window_params = [{transform_indices = @transform_0, window_bounds = array<i64: 1, 1, 32, 32>}, {transform_indices = @transform_1, window_bounds = array<i64: 1, 8, 32, 32>}, {transform_indices = @transform_2, window_bounds = array<i64: 1, 1, 32, 32>}, {pipeline_mode = #tpu.pipeline_mode<synchronous>, transform_indices = @transform_3, window_bounds = array<i64: 9, 32, 32>}, {pipeline_mode = #tpu.pipeline_mode<synchronous>, transform_indices = @transform_4, window_bounds = array<i64: 1, 32>}, {pipeline_mode = #tpu.pipeline_mode<synchronous>, transform_indices = @transform_5, window_bounds = array<i64: 1, 32>}, {pipeline_mode = #tpu.pipeline_mode<synchronous>, transform_indices = @transform_6, window_bounds = array<i64: 8, 32>}, {pipeline_mode = #tpu.pipeline_mode<synchronous>, transform_indices = @transform_7, window_bounds = array<i64: 8, 1>}, {transform_indices = @transform_8, window_bounds = array<i64: 1, 8, 256>}]} {
    %cst = arith.constant 0.000000e+00 : f32
    %0 = vector.broadcast %cst : f32 to vector<10x1x32xf32>
    %c0 = arith.constant 0 : index
    %c0_0 = arith.constant 0 : index
    %c0_1 = arith.constant 0 : index
    %1 = vector.load %arg11[%c0, %c0_0, %c0_1] : memref<10x34x32xf32, #tpu.memory_space<vmem>>, vector<10x1x32xf32>
    tpu.vector_store %arg11[%c0, %c0_0, %c0_1], %0 {strides = array<i32>} : memref<10x34x32xf32, #tpu.memory_space<vmem>>, vector<10x1x32xf32>,
    %cst_2 = arith.constant 0.000000e+00 : f32
    %2 = vector.broadcast %cst_2 : f32 to vector<10x1x32xf32>
    %c0_3 = arith.constant 0 : index
    %c33 = arith.constant 33 : index
    %c0_4 = arith.constant 0 : index
    %3 = vector.load %arg11[%c0_3, %c33, %c0_4] : memref<10x34x32xf32, #tpu.memory_space<vmem>>, vector<10x1x32xf32>
    tpu.vector_store %arg11[%c0_3, %c33, %c0_4], %2 {strides = array<i32>} : memref<10x34x32xf32, #tpu.memory_space<vmem>>, vector<10x1x32xf32>,
    %c0_5 = arith.constant 0 : index
    %c0_6 = arith.constant 0 : index
    %c0_7 = arith.constant 0 : index
    %c0_8 = arith.constant 0 : index
    %4 = vector.load %arg3[%c0_5, %c0_6, %c0_7, %c0_8] : memref<1x8x32x32xbf16, #tpu.memory_space<vmem>>, vector<1x8x32x32xbf16>
    %5 = vector.shape_cast %4 : vector<1x8x32x32xbf16> to vector<8x32x32xbf16>
    %6 = arith.extf %5 : vector<8x32x32xbf16> to vector<8x32x32xf32>
    %cst_9 = arith.constant 0.000000e+00 : f32
    %7 = vector.broadcast %cst_9 : f32 to vector<8x32x32xf32>
    %8 = arith.maximumf %6, %7 : vector<8x32x32xf32>
    %c1 = arith.constant 1 : index
    %c1_10 = arith.constant 1 : index
    %c0_11 = arith.constant 0 : index
    %9 = vector.load %arg11[%c1, %c1_10, %c0_11] : memref<10x34x32xf32, #tpu.memory_space<vmem>>, vector<8x32x32xf32>
    tpu.vector_store %arg11[%c1, %c1_10, %c0_11], %8 {strides = array<i32>} : memref<10x34x32xf32, #tpu.memory_space<vmem>>, vector<8x32x32xf32>,
    %c0_12 = arith.constant 0 : index
    %c0_13 = arith.constant 0 : index
    %c0_14 = arith.constant 0 : index
    %c0_15 = arith.constant 0 : index
    %10 = vector.load %arg2[%c0_12, %c0_13, %c0_14, %c0_15] : memref<1x1x32x32xbf16, #tpu.memory_space<vmem>>, vector<1x1x32x32xbf16>
    %11 = vector.shape_cast %10 : vector<1x1x32x32xbf16> to vector<1x32x32xbf16>
    %12 = arith.extf %11 : vector<1x32x32xbf16> to vector<1x32x32xf32>
    %cst_16 = arith.constant 0.000000e+00 : f32
    %13 = vector.broadcast %cst_16 : f32 to vector<1x32x32xf32>
    %14 = arith.maximumf %12, %13 : vector<1x32x32xf32>
    %c0_i32 = arith.constant 0 : i32
    %15 = arith.cmpi sgt, %arg1, %c0_i32 : i32
    %cst_17 = arith.constant 0.000000e+00 : f32
    %16 = vector.broadcast %cst_17 : f32 to vector<1x32x32xf32>
    %17 = arith.select %15, %14, %16 : vector<1x32x32xf32>
    %c0_18 = arith.constant 0 : index
    %c1_19 = arith.constant 1 : index
    %c0_20 = arith.constant 0 : index
    %18 = vector.load %arg11[%c0_18, %c1_19, %c0_20] : memref<10x34x32xf32, #tpu.memory_space<vmem>>, vector<1x32x32xf32>
    tpu.vector_store %arg11[%c0_18, %c1_19, %c0_20], %17 {strides = array<i32>} : memref<10x34x32xf32, #tpu.memory_space<vmem>>, vector<1x32x32xf32>,
    %c0_21 = arith.constant 0 : index
    %c0_22 = arith.constant 0 : index
    %c0_23 = arith.constant 0 : index
    %c0_24 = arith.constant 0 : index
    %19 = vector.load %arg4[%c0_21, %c0_22, %c0_23, %c0_24] : memref<1x1x32x32xbf16, #tpu.memory_space<vmem>>, vector<1x1x32x32xbf16>
    %20 = vector.shape_cast %19 : vector<1x1x32x32xbf16> to vector<1x32x32xbf16>
    %21 = arith.extf %20 : vector<1x32x32xbf16> to vector<1x32x32xf32>
    %cst_25 = arith.constant 0.000000e+00 : f32
    %22 = vector.broadcast %cst_25 : f32 to vector<1x32x32xf32>
    %23 = arith.maximumf %21, %22 : vector<1x32x32xf32>
    %c3_i32 = arith.constant 3 : i32
    %24 = arith.cmpi slt, %arg1, %c3_i32 : i32
    %cst_26 = arith.constant 0.000000e+00 : f32
    %25 = vector.broadcast %cst_26 : f32 to vector<1x32x32xf32>
    %26 = arith.select %24, %23, %25 : vector<1x32x32xf32>
    %c9 = arith.constant 9 : index
    %c1_27 = arith.constant 1 : index
    %c0_28 = arith.constant 0 : index
    %27 = vector.load %arg11[%c9, %c1_27, %c0_28] : memref<10x34x32xf32, #tpu.memory_space<vmem>>, vector<1x32x32xf32>
    tpu.vector_store %arg11[%c9, %c1_27, %c0_28], %26 {strides = array<i32>} : memref<10x34x32xf32, #tpu.memory_space<vmem>>, vector<1x32x32xf32>,
    %cst_29 = arith.constant 0.000000e+00 : f32
    %28 = vector.broadcast %cst_29 : f32 to vector<256x32xf32>
    %c0_30 = arith.constant 0 : index
    %c0_31 = arith.constant 0 : index
    %c0_32 = arith.constant 0 : index
    %29 = vector.load %arg11[%c0_30, %c0_31, %c0_32] : memref<10x34x32xf32, #tpu.memory_space<vmem>>, vector<8x32x32xf32>
    %30 = vector.shape_cast %29 : vector<8x32x32xf32> to vector<256x32xf32>
    %31 = arith.truncf %30 : vector<256x32xf32> to vector<256x32xbf16>
    %c0_33 = arith.constant 0 : index
    %c0_34 = arith.constant 0 : index
    %c0_35 = arith.constant 0 : index
    %32 = vector.load %arg5[%c0_33, %c0_34, %c0_35] : memref<9x32x32xbf16, #tpu.memory_space<vmem>>, vector<1x32x32xbf16>
    %33 = vector.shape_cast %32 : vector<1x32x32xbf16> to vector<32x32xbf16>
    %cst_36 = arith.constant dense<0.000000e+00> : vector<256x32xf32>
    %34 = tpu.matmul %31, %33, %cst_36 {dimension_numbers = #tpu.dot_dimension_numbers<[1], [0], [0], [1], [0, 0, 1, 1], [], []>} : vector<256x32xbf16>, vector<32x32xbf16>, vector<256x32xf32> -> vector<256x32xf32>
    %35 = arith.addf %28, %34 : vector<256x32xf32>
    %c0_37 = arith.constant 0 : index
    %c1_38 = arith.constant 1 : index
    %c0_39 = arith.constant 0 : index
    %36 = vector.load %arg11[%c0_37, %c1_38, %c0_39] : memref<10x34x32xf32, #tpu.memory_space<vmem>>, vector<8x32x32xf32>
    %37 = vector.shape_cast %36 : vector<8x32x32xf32> to vector<256x32xf32>
    %38 = arith.truncf %37 : vector<256x32xf32> to vector<256x32xbf16>
    %c1_40 = arith.constant 1 : index
    %c0_41 = arith.constant 0 : index
    %c0_42 = arith.constant 0 : index
    %39 = vector.load %arg5[%c1_40, %c0_41, %c0_42] : memref<9x32x32xbf16, #tpu.memory_space<vmem>>, vector<1x32x32xbf16>
    %40 = vector.shape_cast %39 : vector<1x32x32xbf16> to vector<32x32xbf16>
    %cst_43 = arith.constant dense<0.000000e+00> : vector<256x32xf32>
    %41 = tpu.matmul %38, %40, %cst_43 {dimension_numbers = #tpu.dot_dimension_numbers<[1], [0], [0], [1], [0, 0, 1, 1], [], []>} : vector<256x32xbf16>, vector<32x32xbf16>, vector<256x32xf32> -> vector<256x32xf32>
    %42 = arith.addf %35, %41 : vector<256x32xf32>
    %c0_44 = arith.constant 0 : index
    %c2 = arith.constant 2 : index
    %c0_45 = arith.constant 0 : index
    %43 = vector.load %arg11[%c0_44, %c2, %c0_45] : memref<10x34x32xf32, #tpu.memory_space<vmem>>, vector<8x32x32xf32>
    %44 = vector.shape_cast %43 : vector<8x32x32xf32> to vector<256x32xf32>
    %45 = arith.truncf %44 : vector<256x32xf32> to vector<256x32xbf16>
    %c2_46 = arith.constant 2 : index
    %c0_47 = arith.constant 0 : index
    %c0_48 = arith.constant 0 : index
    %46 = vector.load %arg5[%c2_46, %c0_47, %c0_48] : memref<9x32x32xbf16, #tpu.memory_space<vmem>>, vector<1x32x32xbf16>
    %47 = vector.shape_cast %46 : vector<1x32x32xbf16> to vector<32x32xbf16>
    %cst_49 = arith.constant dense<0.000000e+00> : vector<256x32xf32>
    %48 = tpu.matmul %45, %47, %cst_49 {dimension_numbers = #tpu.dot_dimension_numbers<[1], [0], [0], [1], [0, 0, 1, 1], [], []>} : vector<256x32xbf16>, vector<32x32xbf16>, vector<256x32xf32> -> vector<256x32xf32>
    %49 = arith.addf %42, %48 : vector<256x32xf32>
    %c1_50 = arith.constant 1 : index
    %c0_51 = arith.constant 0 : index
    %c0_52 = arith.constant 0 : index
    %50 = vector.load %arg11[%c1_50, %c0_51, %c0_52] : memref<10x34x32xf32, #tpu.memory_space<vmem>>, vector<8x32x32xf32>
    %51 = vector.shape_cast %50 : vector<8x32x32xf32> to vector<256x32xf32>
    %52 = arith.truncf %51 : vector<256x32xf32> to vector<256x32xbf16>
    %c3 = arith.constant 3 : index
    %c0_53 = arith.constant 0 : index
    %c0_54 = arith.constant 0 : index
    %53 = vector.load %arg5[%c3, %c0_53, %c0_54] : memref<9x32x32xbf16, #tpu.memory_space<vmem>>, vector<1x32x32xbf16>
    %54 = vector.shape_cast %53 : vector<1x32x32xbf16> to vector<32x32xbf16>
    %cst_55 = arith.constant dense<0.000000e+00> : vector<256x32xf32>
    %55 = tpu.matmul %52, %54, %cst_55 {dimension_numbers = #tpu.dot_dimension_numbers<[1], [0], [0], [1], [0, 0, 1, 1], [], []>} : vector<256x32xbf16>, vector<32x32xbf16>, vector<256x32xf32> -> vector<256x32xf32>
    %56 = arith.addf %49, %55 : vector<256x32xf32>
    %c1_56 = arith.constant 1 : index
    %c1_57 = arith.constant 1 : index
    %c0_58 = arith.constant 0 : index
    %57 = vector.load %arg11[%c1_56, %c1_57, %c0_58] : memref<10x34x32xf32, #tpu.memory_space<vmem>>, vector<8x32x32xf32>
    %58 = vector.shape_cast %57 : vector<8x32x32xf32> to vector<256x32xf32>
    %59 = arith.truncf %58 : vector<256x32xf32> to vector<256x32xbf16>
    %c4 = arith.constant 4 : index
    %c0_59 = arith.constant 0 : index
    %c0_60 = arith.constant 0 : index
    %60 = vector.load %arg5[%c4, %c0_59, %c0_60] : memref<9x32x32xbf16, #tpu.memory_space<vmem>>, vector<1x32x32xbf16>
    %61 = vector.shape_cast %60 : vector<1x32x32xbf16> to vector<32x32xbf16>
    %cst_61 = arith.constant dense<0.000000e+00> : vector<256x32xf32>
    %62 = tpu.matmul %59, %61, %cst_61 {dimension_numbers = #tpu.dot_dimension_numbers<[1], [0], [0], [1], [0, 0, 1, 1], [], []>} : vector<256x32xbf16>, vector<32x32xbf16>, vector<256x32xf32> -> vector<256x32xf32>
    %63 = arith.addf %56, %62 : vector<256x32xf32>
    %c1_62 = arith.constant 1 : index
    %c2_63 = arith.constant 2 : index
    %c0_64 = arith.constant 0 : index
    %64 = vector.load %arg11[%c1_62, %c2_63, %c0_64] : memref<10x34x32xf32, #tpu.memory_space<vmem>>, vector<8x32x32xf32>
    %65 = vector.shape_cast %64 : vector<8x32x32xf32> to vector<256x32xf32>
    %66 = arith.truncf %65 : vector<256x32xf32> to vector<256x32xbf16>
    %c5 = arith.constant 5 : index
    %c0_65 = arith.constant 0 : index
    %c0_66 = arith.constant 0 : index
    %67 = vector.load %arg5[%c5, %c0_65, %c0_66] : memref<9x32x32xbf16, #tpu.memory_space<vmem>>, vector<1x32x32xbf16>
    %68 = vector.shape_cast %67 : vector<1x32x32xbf16> to vector<32x32xbf16>
    %cst_67 = arith.constant dense<0.000000e+00> : vector<256x32xf32>
    %69 = tpu.matmul %66, %68, %cst_67 {dimension_numbers = #tpu.dot_dimension_numbers<[1], [0], [0], [1], [0, 0, 1, 1], [], []>} : vector<256x32xbf16>, vector<32x32xbf16>, vector<256x32xf32> -> vector<256x32xf32>
    %70 = arith.addf %63, %69 : vector<256x32xf32>
    %c2_68 = arith.constant 2 : index
    %c0_69 = arith.constant 0 : index
    %c0_70 = arith.constant 0 : index
    %71 = vector.load %arg11[%c2_68, %c0_69, %c0_70] : memref<10x34x32xf32, #tpu.memory_space<vmem>>, vector<8x32x32xf32>
    %72 = vector.shape_cast %71 : vector<8x32x32xf32> to vector<256x32xf32>
    %73 = arith.truncf %72 : vector<256x32xf32> to vector<256x32xbf16>
    %c6 = arith.constant 6 : index
    %c0_71 = arith.constant 0 : index
    %c0_72 = arith.constant 0 : index
    %74 = vector.load %arg5[%c6, %c0_71, %c0_72] : memref<9x32x32xbf16, #tpu.memory_space<vmem>>, vector<1x32x32xbf16>
    %75 = vector.shape_cast %74 : vector<1x32x32xbf16> to vector<32x32xbf16>
    %cst_73 = arith.constant dense<0.000000e+00> : vector<256x32xf32>
    %76 = tpu.matmul %73, %75, %cst_73 {dimension_numbers = #tpu.dot_dimension_numbers<[1], [0], [0], [1], [0, 0, 1, 1], [], []>} : vector<256x32xbf16>, vector<32x32xbf16>, vector<256x32xf32> -> vector<256x32xf32>
    %77 = arith.addf %70, %76 : vector<256x32xf32>
    %c2_74 = arith.constant 2 : index
    %c1_75 = arith.constant 1 : index
    %c0_76 = arith.constant 0 : index
    %78 = vector.load %arg11[%c2_74, %c1_75, %c0_76] : memref<10x34x32xf32, #tpu.memory_space<vmem>>, vector<8x32x32xf32>
    %79 = vector.shape_cast %78 : vector<8x32x32xf32> to vector<256x32xf32>
    %80 = arith.truncf %79 : vector<256x32xf32> to vector<256x32xbf16>
    %c7 = arith.constant 7 : index
    %c0_77 = arith.constant 0 : index
    %c0_78 = arith.constant 0 : index
    %81 = vector.load %arg5[%c7, %c0_77, %c0_78] : memref<9x32x32xbf16, #tpu.memory_space<vmem>>, vector<1x32x32xbf16>
    %82 = vector.shape_cast %81 : vector<1x32x32xbf16> to vector<32x32xbf16>
    %cst_79 = arith.constant dense<0.000000e+00> : vector<256x32xf32>
    %83 = tpu.matmul %80, %82, %cst_79 {dimension_numbers = #tpu.dot_dimension_numbers<[1], [0], [0], [1], [0, 0, 1, 1], [], []>} : vector<256x32xbf16>, vector<32x32xbf16>, vector<256x32xf32> -> vector<256x32xf32>
    %84 = arith.addf %77, %83 : vector<256x32xf32>
    %c2_80 = arith.constant 2 : index
    %c2_81 = arith.constant 2 : index
    %c0_82 = arith.constant 0 : index
    %85 = vector.load %arg11[%c2_80, %c2_81, %c0_82] : memref<10x34x32xf32, #tpu.memory_space<vmem>>, vector<8x32x32xf32>
    %86 = vector.shape_cast %85 : vector<8x32x32xf32> to vector<256x32xf32>
    %87 = arith.truncf %86 : vector<256x32xf32> to vector<256x32xbf16>
    %c8 = arith.constant 8 : index
    %c0_83 = arith.constant 0 : index
    %c0_84 = arith.constant 0 : index
    %88 = vector.load %arg5[%c8, %c0_83, %c0_84] : memref<9x32x32xbf16, #tpu.memory_space<vmem>>, vector<1x32x32xbf16>
    %89 = vector.shape_cast %88 : vector<1x32x32xbf16> to vector<32x32xbf16>
    %cst_85 = arith.constant dense<0.000000e+00> : vector<256x32xf32>
    %90 = tpu.matmul %87, %89, %cst_85 {dimension_numbers = #tpu.dot_dimension_numbers<[1], [0], [0], [1], [0, 0, 1, 1], [], []>} : vector<256x32xbf16>, vector<32x32xbf16>, vector<256x32xf32> -> vector<256x32xf32>
    %91 = arith.addf %84, %90 : vector<256x32xf32>
    %c0_86 = arith.constant 0 : index
    %c0_87 = arith.constant 0 : index
    %92 = vector.load %arg6[%c0_86, %c0_87] : memref<1x32xf32, #tpu.memory_space<vmem>>, vector<1x32xf32>
    %93 = vector.broadcast %92 : vector<1x32xf32> to vector<256x32xf32>
    %94 = arith.mulf %91, %93 : vector<256x32xf32>
    %c0_88 = arith.constant 0 : index
    %c0_89 = arith.constant 0 : index
    %95 = vector.load %arg7[%c0_88, %c0_89] : memref<1x32xf32, #tpu.memory_space<vmem>>, vector<1x32xf32>
    %96 = vector.broadcast %95 : vector<1x32xf32> to vector<256x32xf32>
    %97 = arith.addf %94, %96 : vector<256x32xf32>
    %cst_90 = arith.constant 0.000000e+00 : f32
    %98 = vector.broadcast %cst_90 : f32 to vector<256x32xf32>
    %99 = arith.maximumf %97, %98 : vector<256x32xf32>
    %c0_91 = arith.constant 0 : index
    %c0_92 = arith.constant 0 : index
    %100 = vector.load %arg8[%c0_91, %c0_92] : memref<8x32xbf16, #tpu.memory_space<vmem>>, vector<8x32xbf16>
    %101 = arith.truncf %99 : vector<256x32xf32> to vector<256x32xbf16>
    %cst_93 = arith.constant dense<0.000000e+00> : vector<8x256xf32>
    %102 = tpu.matmul %100, %101, %cst_93 {dimension_numbers = #tpu.dot_dimension_numbers<[1], [1], [0], [0], [0, 0, 1, 0], [], []>} : vector<8x32xbf16>, vector<256x32xbf16>, vector<8x256xf32> -> vector<8x256xf32>
    %c0_94 = arith.constant 0 : index
    %c0_95 = arith.constant 0 : index
    %103 = vector.load %arg9[%c0_94, %c0_95] : memref<8x1xf32, #tpu.memory_space<vmem>>, vector<8x1xf32>
    %104 = vector.broadcast %103 : vector<8x1xf32> to vector<8x256xf32>
    %105 = arith.addf %102, %104 : vector<8x256xf32>
    %c0_96 = arith.constant 0 : index
    %c0_97 = arith.constant 0 : index
    %c0_98 = arith.constant 0 : index
    %106 = vector.load %arg10[%c0_96, %c0_97, %c0_98] : memref<1x8x256xf32, #tpu.memory_space<vmem>>, vector<1x8x256xf32>
    %107 = vector.shape_cast %106 : vector<1x8x256xf32> to vector<8x256xf32>
    %108 = vector.shape_cast %105 : vector<8x256xf32> to vector<1x8x256xf32>
    tpu.vector_store %arg10[%c0_96, %c0_97, %c0_98], %108 {strides = array<i32>} : memref<1x8x256xf32, #tpu.memory_space<vmem>>, vector<1x8x256xf32>,
    return
  }
  func.func @transform_0(%arg0: i32, %arg1: i32) -> (i32, i32, i32, i32) {
    %c8_i32 = arith.constant 8 : i32
    %0 = arith.muli %arg1, %c8_i32 : i32
    %c1_i32 = arith.constant 1 : i32
    %1 = arith.subi %0, %c1_i32 : i32
    %c0_i32 = arith.constant 0 : i32
    %2 = arith.maxsi %1, %c0_i32 : i32
    %c0_i32_0 = arith.constant 0 : i32
    %c0_i32_1 = arith.constant 0 : i32
    %c0_i32_2 = arith.constant 0 : i32
    return %arg0, %2, %c0_i32_0, %c0_i32_1 : i32, i32, i32, i32
  }
  func.func @transform_1(%arg0: i32, %arg1: i32) -> (i32, i32, i32, i32) {
    %c0_i32 = arith.constant 0 : i32
    %c0_i32_0 = arith.constant 0 : i32
    %c0_i32_1 = arith.constant 0 : i32
    return %arg0, %arg1, %c0_i32, %c0_i32_0 : i32, i32, i32, i32
  }
  func.func @transform_2(%arg0: i32, %arg1: i32) -> (i32, i32, i32, i32) {
    %c8_i32 = arith.constant 8 : i32
    %0 = arith.muli %arg1, %c8_i32 : i32
    %c8_i32_0 = arith.constant 8 : i32
    %1 = arith.addi %0, %c8_i32_0 : i32
    %c31_i32 = arith.constant 31 : i32
    %2 = arith.minsi %1, %c31_i32 : i32
    %c0_i32 = arith.constant 0 : i32
    %c0_i32_1 = arith.constant 0 : i32
    %c0_i32_2 = arith.constant 0 : i32
    return %arg0, %2, %c0_i32, %c0_i32_1 : i32, i32, i32, i32
  }
  func.func @transform_3(%arg0: i32, %arg1: i32) -> (i32, i32, i32) {
    %c0_i32 = arith.constant 0 : i32
    %c0_i32_0 = arith.constant 0 : i32
    %c0_i32_1 = arith.constant 0 : i32
    %c0_i32_2 = arith.constant 0 : i32
    return %c0_i32, %c0_i32_0, %c0_i32_1 : i32, i32, i32
  }
  func.func @transform_4(%arg0: i32, %arg1: i32) -> (i32, i32) {
    %c0_i32 = arith.constant 0 : i32
    %c0_i32_0 = arith.constant 0 : i32
    %c0_i32_1 = arith.constant 0 : i32
    return %c0_i32, %c0_i32_0 : i32, i32
  }
  func.func @transform_5(%arg0: i32, %arg1: i32) -> (i32, i32) {
    %c0_i32 = arith.constant 0 : i32
    %c0_i32_0 = arith.constant 0 : i32
    %c0_i32_1 = arith.constant 0 : i32
    return %c0_i32, %c0_i32_0 : i32, i32
  }
  func.func @transform_6(%arg0: i32, %arg1: i32) -> (i32, i32) {
    %c0_i32 = arith.constant 0 : i32
    %c0_i32_0 = arith.constant 0 : i32
    %c0_i32_1 = arith.constant 0 : i32
    return %c0_i32, %c0_i32_0 : i32, i32
  }
  func.func @transform_7(%arg0: i32, %arg1: i32) -> (i32, i32) {
    %c0_i32 = arith.constant 0 : i32
    %c0_i32_0 = arith.constant 0 : i32
    %c0_i32_1 = arith.constant 0 : i32
    return %c0_i32, %c0_i32_0 : i32, i32
  }
  func.func @transform_8(%arg0: i32, %arg1: i32) -> (i32, i32, i32) {
    %c0_i32 = arith.constant 0 : i32
    %c0_i32_0 = arith.constant 0 : i32
    return %arg0, %c0_i32, %arg1 : i32, i32, i32
  }
}

</mosaic_0001>

<bundles_post_ra>
// kernel: base_net_head_forward.1
= control target key start
LH: loop header
LB: loop body
LE: loop exit
PB: predicated region body
PF: predicated region fallthrough
CT: control target
= control target key end

     0   :  { %s3598_s27 = smov 0   ;;  %s3600_s28 = smov 0   ;;  %s4538_s0 = inlined_call_operand.vmem [shape: bf16[2,32,32,32], index: 0, kind: input, shape index: {}, may-alias: {0,1,2}]   ;;  %s4539_s1 = inlined_call_operand.vmem [shape: bf16[2,32,32,32], index: 1, kind: input, shape index: {}, may-alias: {0,1,2}]   ;;  %s4540_s2 = inlined_call_operand.vmem [shape: bf16[2,32,32,32], index: 2, kind: input, shape index: {}, may-alias: {0,1,2}]   ;;  %s4541_s3 = inlined_call_operand.vmem [shape: bf16[9,32,32], index: 3, kind: input, shape index: {}]   ;;  %s4542_s4 = inlined_call_operand.vmem [shape: f32[1,32], index: 4, kind: input, shape index: {}]   ;;  %s4543_s5 = inlined_call_operand.vmem [shape: f32[1,32], index: 5, kind: input, shape index: {}]   ;;  %s4544_s6 = inlined_call_operand.vmem [shape: bf16[8,32], index: 6, kind: input, shape index: {}]   ;;  %s4545_s7 = inlined_call_operand.vmem [shape: f32[8,1], index: 7, kind: input, shape index: {}]   ;;  %s4546_s8 = inlined_call_operand.vmem [shape: f32[2,8,1024], index: 8, kind: output, shape index: {}]  }
   0x1   :  { %s3602_s29 = smov 0   ;;  %s3604_s30 = smov 0  }
   0x2   :  { %s3606_s9 = smov 0  }
   0x3 LB: > { %s27_s10 = sadd.s32 1, %s3541_s29  ;;  %s30_s11 = sadd.s32 1, %s3545_s30  ;;  %s3549_s9 = sphi %s3606_s9, %s18_s9   ;;  %s3545_s30 = sphi %s3604_s30, %s4599_s30   ;;  %s3541_s29 = sphi %s3602_s29, %s4598_s29   ;;  %s3537_s28 = sphi %s3600_s28, %s4597_s28   ;;  %s3533_s27 = sphi %s3598_s27, %s4596_s27  }
   0x4   : > { %p28_p0 = scmp.ge.s32.totalorder %s27_s10, 4  ;;  %p3066_p1 = scmp.ge.s32.totalorder %s3549_s9, 1 }
   0x5   : > { %p348_p2 = scmp.lt.s32.totalorder %s3549_s9, 9 }
   0x6   : > { %s4601_s10 = smov (%p28_p0, %s27_s10), 0  ;;  %s4603_s11 = smov (!%p28_p0, %s30_s11), %s3545_s30 }
   0x7   : > { %p349_p3 = pnand %p3066_p1, %p348_p2  ;;  %p32_p4 = scmp.ge.s32.totalorder %s4603_s11, 2 }
   0x9   : > { %s4605_s11 = smov (%p32_p4, %s4603_s11), 0  ;;  %352 = sbr.rel (%p349_p3) target bundleno = 973 (0x3cd), region = 52 }
   0xe   : > { %v3348_v0 = vld [vmem:[%s4541_s3 + $0x18] sm:$0xff]  ;;  %s3634_s14 = sshll.u32 %s3533_s27, 3  ;;  %p421_p5 = scmp.lt.s32.totalorder %s3537_s28, 1  ;;  %v3347_v1 = vld [vmem:[%s4541_s3 + $0x10] sm:$0xff]  ;;  %vm591_vm0 = vcmask 261120   ;;  %vm473_vm2 = vcmask 253952  }
   0xf   : > { %p437_p6 = scmp.lt.s32.totalorder %s3634_s14, 31  ;;  %s3638_s15 = sadd.s32 4294967295, %s3634_s14  ;;  %3460 = vmatpush.bf16.msra.mxu1 %v3348_v0  ;;  %3462 = vmatpush.bf16.msra.mxu3 %v3348_v0 }
  0x10   : > { %s4607_s28 = smov (!%p421_p5, %s3537_s28), 1  ;;  %844 = vmatpush.bf16.msra.mxu0 %v3348_v0  ;;  %3461 = vmatpush.bf16.msra.mxu2 %v3348_v0  ;;  %p419_p7 = scmp.gt.s32.totalorder %s3638_s15, 0 }
  0x11   : > { %s438_s18 = scalar_select %p437_p6, %s3634_s14, 31 }
  0x12   : > { %s3647_s19 = sshll.u32 %s4607_s28, 7  ;;  %p3069_p8 = scmp.lt.s32.totalorder %s3638_s15, 31 }
  0x13   : > { %s3078_s20 = sshll.u32 %s438_s18, 2  ;;  %3463 = vmatpush.bf16.msra.mxu1 %v3347_v1  ;;  %3465 = vmatpush.bf16.msra.mxu3 %v3347_v1  ;;  %p636_p9 = scmp.gt.s32.totalorder %s3533_s27, 0 }
  0x14   : > { %s441_s21 = sadd.s32 %s3078_s20, %s3647_s19  ;;  %845 = vmatpush.bf16.msra.mxu0 %v3347_v1  ;;  %3464 = vmatpush.bf16.msra.mxu2 %v3347_v1  ;;  %p660_p11 = scmp.lt.s32.totalorder %s3533_s27, 3 }
  0x15   : > { %s3080_s22 = sshll.u32 %s441_s21, 2  ;;  %s3088_s17 = sshll.u32 %s3533_s27, 1 }
  0x16   : > { %s3655_s25 = scalar_lea.vmem %s4539_s1, %s3080_s22  ;;  %p465_p12 = scmp.lt.s32.totalorder %s3088_s17, 7 }
  0x17   : > { %v3445_v2 = vld [vmem:[%s3655_s25 + $0x18] sm:$0xff]   ;;  %v3451_v3 = vld [vmem:[%s3655_s25 + $0x48] sm:$0xff]   ;;  %s420_s26 = scalar_select %p419_p7, %s3638_s15, 0  ;;  %v3446_v4 = vld [vmem:[%s3655_s25 + $0x20] sm:$0xff]  }
  0x18   : > { %v3377_v5 = vunpack.c.l.bf16 %v3445_v2  ;;  %v3378_v6 = vunpack.c.h.bf16 %v3445_v2  ;;  %v3401_v7 = vunpack.c.l.bf16 %v3451_v3  ;;  %v3402_v8 = vunpack.c.h.bf16 %v3451_v3  ;;  %v3452_v9 = vld [vmem:[%s3655_s25 + $0x50] sm:$0xff]   ;;  %v3449_v12 = vld [vmem:[%s3655_s25 + $0x38] sm:$0xff]   ;;  %s637_s12 = scalar_select %p636_p9, 1, 0  ;;  %v3447_v24 = vld [vmem:[%s3655_s25 + $0x28] sm:$0xff]  }
  0x19   : > { %s4609_s26 = smov (!%p3069_p8, %s420_s26), 31  ;;  %v3381_v10 = vunpack.c.l.bf16 %v3446_v4  ;;  %v3382_v11 = vunpack.c.h.bf16 %v3446_v4  ;;  %v3405_v16 = vunpack.c.l.bf16 %v3452_v9  ;;  %v3406_v18 = vunpack.c.h.bf16 %v3452_v9  ;;  %v3453_v36 = vld [vmem:[%s3655_s25 + $0x58] sm:$0xff]   ;;  %v3364_v43 = vld [vmem:[%s3655_s25] sm:$0xff]   ;;  %s4615_s17 = smov (!%p465_p12, %s3088_s17), 7 }
  0x1a   : > { %v564_v13 = vmax.f32 %v3377_v5, 0.0  ;;  %v565_v14 = vmax.f32 %v3378_v6, 0.0  ;;  %v576_v15 = vmax.f32 %v3401_v7, 0.0  ;;  %v577_v17 = vmax.f32 %v3402_v8, 0.0  ;;  %s3074_s13 = sshll.u32 %s4609_s26, 2  ;;  %v3450_v62 = vld [vmem:[%s3655_s25 + $0x40] sm:$0xff]  }
  0x1b   : > { %s427_s16 = sadd.s32 %s3647_s19, %s3074_s13  ;;  %v566_v19 = vmax.f32 %v3381_v10, 0.0  ;;  %v3393_v20 = vunpack.c.l.bf16 %v3449_v12  ;;  %v567_v21 = vmax.f32 %v3382_v11, 0.0  ;;  %v638_v22 = vstv %s637_s12  ;;  %v3448_v7 = vld [vmem:[%s3655_s25 + $0x30] sm:$0xff]   ;;  %v3454_v8 = vld [vmem:[%s3655_s25 + $0x60] sm:$0xff]   ;;  %s3089_s18 = sshll.u32 %s4607_s28, 3 }
  0x1c   : > { %598 = vst.msk [vmem:[#allocation2 + $0x61] sm:$0xff] %vm591_vm0, %v564_v13  ;;  %s3076_s15 = sshll.u32 %s427_s16, 2  ;;  %v578_v23 = vmax.f32 %v3405_v16, 0.0  ;;  %v579_v26 = vmax.f32 %v3406_v18, 0.0  ;;  %vm3678_vm1 = vcmp.eq.s32.totalorder %v638_v22, 1  ;;  %v3394_v34 = vunpack.c.h.bf16 %v3449_v12  ;;  %s446_s16 = sadd.s32 8, %s3634_s14 }
  0x1d   : > { %599 = vst.msk [vmem:[#allocation2 + $0x69] sm:$0xff] %vm591_vm0, %v565_v14  ;;  %s429_s20 = scalar_lea.vmem %s4538_s0, %s3076_s15  ;;  %v572_v28 = vmax.f32 %v3393_v20, 0.0  ;;  %v3385_v35 = vunpack.c.l.bf16 %v3447_v24  ;;  %v3386_v42 = vunpack.c.h.bf16 %v3447_v24  ;;  %v3409_v48 = vunpack.c.l.bf16 %v3453_v36  ;;  %p4268_p10 = scmp.lt.s32.totalorder %s446_s16, 31 }
  0x1e   : > { %610 = vst.msk [vmem:[#allocation2 + $0xd9] sm:$0xff] %vm591_vm0, %v576_v15  ;;  %v3428_v25 = vld [vmem:[%s429_s20] sm:$0xff]   ;;  %v3458_v27 = vld [vmem:[%s429_s20 + $0x8] sm:$0xff]   ;;  %v573_v52 = vmax.f32 %v3394_v34, 0.0  ;;  %v3410_v53 = vunpack.c.h.bf16 %v3453_v36  ;;  %v3365_v56 = vunpack.c.l.bf16 %v3364_v43  ;;  %v3366_v59 = vunpack.c.h.bf16 %v3364_v43  ;;  %s661_s26 = scalar_select %p660_p11, 1, 0 }
  0x1f   : > { %611 = vst.msk [vmem:[#allocation2 + $0xe1] sm:$0xff] %vm591_vm0, %v577_v17  ;;  %v3429_v29 = vunpack.c.l.bf16 %v3428_v25  ;;  %v3430_v30 = vunpack.c.h.bf16 %v3428_v25  ;;  %v3433_v31 = vunpack.c.l.bf16 %v3458_v27  ;;  %v3434_v32 = vunpack.c.h.bf16 %v3458_v27  ;;  %s4611_s16 = smov (!%p4268_p10, %s446_s16), 31  ;;  %s468_s14 = sadd.s32 %s3089_s18, %s4615_s17 }
  0x20   : > { %600 = vst.msk [vmem:[#allocation2 + $0x79] sm:$0xff] %vm591_vm0, %v566_v19  ;;  %v568_v55 = vmax.f32 %v3385_v35, 0.0  ;;  %v569_v58 = vmax.f32 %v3386_v42, 0.0  ;;  %v580_v60 = vmax.f32 %v3409_v48, 0.0  ;;  %v581_v61 = vmax.f32 %v3410_v53, 0.0  ;;  %s4613_s16 = smov (!%p4268_p10, %s4611_s16), 31 }
  0x21   : > { %601 = vst.msk [vmem:[#allocation2 + $0x81] sm:$0xff] %vm591_vm0, %v567_v21  ;;  %v632_v37 = vmax.f32 %v3429_v29, 0.0  ;;  %v633_v38 = vmax.f32 %v3430_v30, 0.0  ;;  %v634_v39 = vmax.f32 %v3433_v31, 0.0  ;;  %v635_v40 = vmax.f32 %v3434_v32, 0.0  ;;  %s3090_s20 = sshll.u32 %s468_s14, 3 }
  0x22   : > { %612 = vst.msk [vmem:[#allocation2 + $0xf1] sm:$0xff] %vm591_vm0, %v578_v23  ;;  %v558_v63 = vmax.f32 %v3365_v56, 0.0  ;;  %v3397_v0 = vunpack.c.l.bf16 %v3450_v62  ;;  %v3398_v1 = vunpack.c.h.bf16 %v3450_v62  ;;  %v559_v2 = vmax.f32 %v3366_v59, 0.0  ;;  %v3443_v23 = vld [vmem:[%s3655_s25 + $0x8] sm:$0xff]  }
  0x23   : > { %v735_v41 = vld [vmem:[#allocation2 + $0x61] sm:$0xff]  ;;  %613 = vst.msk [vmem:[#allocation2 + $0xf9] sm:$0xff] %vm591_vm0, %v579_v26  ;;  %v640_v45 = vsel %vm3678_vm1, %v632_v37, 0.0  ;;  %v641_v46 = vsel %vm3678_vm1, %v633_v38, 0.0  ;;  %v642_v47 = vsel %vm3678_vm1, %v634_v39, 0.0  ;;  %v643_v51 = vsel %vm3678_vm1, %v635_v40, 0.0 }
  0x24   : > { %v736_v44 = vld [vmem:[#allocation2 + $0x69] sm:$0xff]  ;;  %606 = vst.msk [vmem:[#allocation2 + $0xb1] sm:$0xff] %vm591_vm0, %v572_v28  ;;  %v574_v4 = vmax.f32 %v3397_v0, 0.0  ;;  %v575_v6 = vmax.f32 %v3398_v1, 0.0  ;;  %v3389_v11 = vunpack.c.l.bf16 %v3448_v7  ;;  %v3390_v12 = vunpack.c.h.bf16 %v3448_v7 }
  0x25   : > { %v3694_v49 = vpack.c.bf16 %v736_v44, %v735_v41  ;;  %v747_v50 = vld [vmem:[#allocation2 + $0xd9] sm:$0xff]  ;;  %644 = vst.msk [vmem:[#allocation2 + $0x1] sm:$0xff] %vm591_vm0, %v640_v45  ;;  %v3413_v13 = vunpack.c.l.bf16 %v3454_v8  ;;  %v3414_v15 = vunpack.c.h.bf16 %v3454_v8  ;;  %v3369_v26 = vunpack.c.l.bf16 %v3443_v23  ;;  %v3455_v37 = vld [vmem:[%s3655_s25 + $0x68] sm:$0xff]   ;;  %v3351_v7 = vld [vmem:[%s4541_s3 + $0x30] sm:$0xff] }
  0x26   : > { %v748_v54 = vld [vmem:[#allocation2 + $0xe1] sm:$0xff]  ;;  %645 = vst.msk [vmem:[#allocation2 + $0x9] sm:$0xff] %vm591_vm0, %v641_v46  ;;  %v570_v18 = vmax.f32 %v3389_v11, 0.0  ;;  %v571_v19 = vmax.f32 %v3390_v12, 0.0  ;;  %v3370_v27 = vunpack.c.h.bf16 %v3443_v23  ;;  %v3417_v38 = vunpack.c.l.bf16 %v3455_v37 }
  0x27   : > { %3108 = vmatmul.msk.bf16.vlgmr.msra.gmra.mxu1 %vm591_vm0, %v3694_v49  ;;  %v3702_v57 = vpack.c.bf16 %v748_v54, %v747_v50  ;;  %646 = vst.msk [vmem:[#allocation2 + $0x11] sm:$0xff] %vm591_vm0, %v642_v47  ;;  %v737_v14 = vld [vmem:[#allocation2 + $0x79] sm:$0xff]  ;;  %v582_v20 = vmax.f32 %v3413_v13, 0.0  ;;  %v583_v22 = vmax.f32 %v3414_v15, 0.0  ;;  %v560_v29 = vmax.f32 %v3369_v26, 0.0  ;;  %v3350_v41 = vld [vmem:[%s4541_s3 + $0x28] sm:$0xff] }
  0x28   : > { %647 = vst.msk [vmem:[#allocation2 + $0x19] sm:$0xff] %vm591_vm0, %v643_v51  ;;  %v738_v16 = vld [vmem:[#allocation2 + $0x81] sm:$0xff]  ;;  %v561_v30 = vmax.f32 %v3370_v27, 0.0  ;;  %v3418_v39 = vunpack.c.h.bf16 %v3455_v37  ;;  %v584_v45 = vmax.f32 %v3417_v38, 0.0  ;;  %1195 = vmatpush.bf16.msrb.mxu2 %v3350_v41  ;;  %v3551_v53 = vmov 0.0  }
  0x29   : > { %3114 = vmatmul.msk.bf16.vlgmr.msra.gmra.mxu3 %vm591_vm0, %v3702_v57  ;;  %607 = vst.msk [vmem:[#allocation2 + $0xb9] sm:$0xff] %vm591_vm0, %v573_v52  ;;  %v749_v24 = vld [vmem:[#allocation2 + $0xf1] sm:$0xff]  ;;  %v3725_v28 = vpack.c.bf16 %v738_v16, %v737_v14  ;;  %v3346_v44 = vld [vmem:[%s4541_s3 + $0x8] sm:$0xff]  ;;  %v3349_v47 = vld [vmem:[%s4541_s3 + $0x20] sm:$0xff] }
  0x2a   : > { %602 = vst.msk [vmem:[#allocation2 + $0x89] sm:$0xff] %vm591_vm0, %v568_v55  ;;  %v750_v25 = vld [vmem:[#allocation2 + $0xf9] sm:$0xff]  ;;  %v585_v46 = vmax.f32 %v3418_v39, 0.0  ;;  %993 = vmatpush.bf16.msrb.mxu1 %v3346_v44 }
  0x2b   : > { %603 = vst.msk [vmem:[#allocation2 + $0x91] sm:$0xff] %vm591_vm0, %v569_v58  ;;  %v743_v10 = vld [vmem:[#allocation2 + $0xb1] sm:$0xff]  ;;  %v3731_v31 = vpack.c.bf16 %v750_v25, %v749_v24  ;;  %v3345_v51 = vld [vmem:[%s4541_s3] sm:$0xff] }
  0x2c   : > { %v725_v3 = vld [vmem:[#allocation2 + $0x1] sm:$0xff]  ;;  %614 = vst.msk [vmem:[#allocation2 + $0x101] sm:$0xff] %vm591_vm0, %v580_v60  ;;  %1196 = vmatpush.bf16.msrb.mxu2 %v3349_v47 }
  0x2d   : > { %v726_v5 = vld [vmem:[#allocation2 + $0x9] sm:$0xff]  ;;  %615 = vst.msk [vmem:[#allocation2 + $0x109] sm:$0xff] %vm591_vm0, %v581_v61  ;;  %v3353_v14 = vld [vmem:[%s4541_s3 + $0x40] sm:$0xff] }
  0x2e   : > { %v757_v9 = vpack.c.bf16 %v726_v5, %v725_v3  ;;  %592 = vst.msk [vmem:[#allocation2 + $0x29] sm:$0xff] %vm591_vm0, %v558_v63  ;;  %v727_v32 = vld [vmem:[#allocation2 + $0x11] sm:$0xff]  ;;  %994 = vmatpush.bf16.msrb.mxu1 %v3345_v51  ;;  %v1076_v59 = vld [vmem:[#allocation2 + $0x2] sm:$0xff] }
  0x2f   : > { %593 = vst.msk [vmem:[#allocation2 + $0x31] sm:$0xff] %vm591_vm0, %v559_v2  ;;  %v728_v33 = vld [vmem:[#allocation2 + $0x19] sm:$0xff]  ;;  %v1077_v60 = vld [vmem:[#allocation2 + $0xa] sm:$0xff] }
  0x30   : > { %3103 = vmatmul.msk.bf16.vlgmr.msra.gmra.mxu0 %vm591_vm0, %v757_v9  ;;  %v744_v17 = vld [vmem:[#allocation2 + $0xb9] sm:$0xff]  ;;  %608 = vst.msk [vmem:[#allocation2 + $0xc9] sm:$0xff] %vm591_vm0, %v574_v4  ;;  %v758_v34 = vpack.c.bf16 %v728_v33, %v727_v32  ;;  %v3444_v61 = vld [vmem:[%s3655_s25 + $0x10] sm:$0xff]   ;;  %v1108_v62 = vpack.c.bf16 %v1077_v60, %v1076_v59  ;;  %v3354_v4 = vld [vmem:[%s4541_s3 + $0x48] sm:$0xff] }
  0x31   : > { %v3720_v21 = vpack.c.bf16 %v744_v17, %v743_v10  ;;  %609 = vst.msk [vmem:[#allocation2 + $0xd1] sm:$0xff] %vm591_vm0, %v575_v6  ;;  %v739_v42 = vld [vmem:[#allocation2 + $0x89] sm:$0xff]  ;;  %v3373_v1 = vunpack.c.l.bf16 %v3444_v61  ;;  %v3352_v2 = vld [vmem:[%s4541_s3 + $0x38] sm:$0xff]  ;;  %v3374_v3 = vunpack.c.h.bf16 %v3444_v61  ;;  %1663 = vmatpush.bf16.msrb.mxu0 %v3354_v4 }
  0x32   : > { %604 = vst.msk [vmem:[#allocation2 + $0xa1] sm:$0xff] %vm591_vm0, %v570_v18  ;;  %v740_v43 = vld [vmem:[#allocation2 + $0x91] sm:$0xff]  ;;  %1429 = vmatpush.bf16.msrb.mxu3 %v3352_v2  ;;  %v1317_v61 = vld [vmem:[#allocation2 + $0x68] sm:$0xff]  ;;  %v1088_v2 = vld [vmem:[#allocation2 + $0x7a] sm:$0xff] }
  0x33   : > { %3112 = vmatmul.msk.bf16.vlgmr.msra.gmra.mxu2 %vm591_vm0, %v3720_v21  ;;  %605 = vst.msk [vmem:[#allocation2 + $0xa9] sm:$0xff] %vm591_vm0, %v571_v19  ;;  %v751_v48 = vld [vmem:[#allocation2 + $0x101] sm:$0xff]  ;;  %v3757_v52 = vpack.c.bf16 %v740_v43, %v739_v42  ;;  %v562_v9 = vmax.f32 %v3373_v1, 0.0  ;;  %v563_v11 = vmax.f32 %v3374_v3, 0.0  ;;  %v1078_v16 = vld [vmem:[#allocation2 + $0x12] sm:$0xff] }
  0x34   : > { %616 = vst.msk [vmem:[#allocation2 + $0x119] sm:$0xff] %vm591_vm0, %v582_v20  ;;  %v752_v50 = vld [vmem:[#allocation2 + $0x109] sm:$0xff] }
  0x35   : > { %617 = vst.msk [vmem:[#allocation2 + $0x121] sm:$0xff] %vm591_vm0, %v583_v22  ;;  %v3763_v54 = vpack.c.bf16 %v752_v50, %v751_v48  ;;  %v729_v55 = vld [vmem:[#allocation2 + $0x29] sm:$0xff]  ;;  %1664 = vmatpush.bf16.msrb.mxu0 %v3353_v14 }
  0x36   : > { %594 = vst.msk [vmem:[#allocation2 + $0x39] sm:$0xff] %vm591_vm0, %v560_v29  ;;  %v730_v56 = vld [vmem:[#allocation2 + $0x31] sm:$0xff]  ;;  %1430 = vmatpush.bf16.msrb.mxu3 %v3351_v7  ;;  %v674_v20 = vld [vmem:[#allocation2 + $0x8] sm:$0xff]  ;;  %v1319_v7 = vld [vmem:[#allocation2 + $0x80] sm:$0xff] }
  0x37   : > { %3109 = vmatmul.msk.bf16.gmra.mxu1 %vm591_vm0, %v3725_v28  ;;  %595 = vst.msk [vmem:[#allocation2 + $0x41] sm:$0xff] %vm591_vm0, %v561_v30  ;;  %v745_v35 = vld [vmem:[#allocation2 + $0xc9] sm:$0xff]  ;;  %v3776_v58 = vpack.c.bf16 %v730_v56, %v729_v55 }
  0x38   : > { %v746_v36 = vld [vmem:[#allocation2 + $0xd1] sm:$0xff]  ;;  %618 = vst.msk [vmem:[#allocation2 + $0x129] sm:$0xff] %vm591_vm0, %v584_v45  ;;  %v1086_v56 = vld [vmem:[#allocation2 + $0x62] sm:$0xff] }
  0x39   : > { %3115 = vmatmul.msk.bf16.gmra.mxu3 %vm591_vm0, %v3731_v31  ;;  %v3741_v40 = vpack.c.bf16 %v746_v36, %v745_v35  ;;  %619 = vst.msk [vmem:[#allocation2 + $0x131] sm:$0xff] %vm591_vm0, %v585_v46  ;;  %v741_v63 = vld [vmem:[#allocation2 + $0xa1] sm:$0xff]  ;;  %v1080_v30 = vld [vmem:[#allocation2 + $0x2a] sm:$0xff]  ;;  %v676_v35 = vld [vmem:[#allocation2 + $0x18] sm:$0xff] }
  0x3a   : > { %474 = vst.msk [vmem:[#allocation2] sm:$0x1] %vm473_vm2, %v3551_v53  ;;  %v742_v0 = vld [vmem:[#allocation2 + $0xa9] sm:$0xff] }
  0x3b   : > { %475 = vst.msk [vmem:[#allocation2 + $0x28] sm:$0x1] %vm473_vm2, %v3551_v53  ;;  %v753_v5 = vld [vmem:[#allocation2 + $0x119] sm:$0xff]  ;;  %v3797_v8 = vpack.c.bf16 %v742_v0, %v741_v63  ;;  %v1311_v37 = vld [vmem:[#allocation2 + $0x30] sm:$0xff]  ;;  %v1089_v3 = vld [vmem:[#allocation2 + $0x82] sm:$0xff] }
  0x3c   : > { %476 = vst.msk [vmem:[#allocation2 + $0x50] sm:$0x1] %vm473_vm2, %v3551_v53  ;;  %v754_v6 = vld [vmem:[#allocation2 + $0x121] sm:$0xff] }
  0x3d   : > { %477 = vst.msk [vmem:[#allocation2 + $0x78] sm:$0x1] %vm473_vm2, %v3551_v53  ;;  %v3802_v10 = vpack.c.bf16 %v754_v6, %v753_v5  ;;  %v731_v12 = vld [vmem:[#allocation2 + $0x39] sm:$0xff]  ;;  %v3871_v5 = vpack.c.bf16 %v1089_v3, %v1088_v2  ;;  %v1324_v2 = vld [vmem:[#allocation2 + $0xb0] sm:$0xff] }
  0x3e   : > { %478 = vst.msk [vmem:[#allocation2 + $0xa0] sm:$0x1] %vm473_vm2, %v3551_v53  ;;  %v732_v13 = vld [vmem:[#allocation2 + $0x41] sm:$0xff]  ;;  %v1081_v32 = vld [vmem:[#allocation2 + $0x32] sm:$0xff] }
  0x3f   : > { %479 = vst.msk [vmem:[#allocation2 + $0xc8] sm:$0x1] %vm473_vm2, %v3551_v53  ;;  %v760_v15 = vpack.c.bf16 %v732_v13, %v731_v12  ;;  %v755_v22 = vld [vmem:[#allocation2 + $0x129] sm:$0xff]  ;;  %v3825_v33 = vpack.c.bf16 %v1081_v32, %v1080_v30  ;;  %v1082_v41 = vld [vmem:[#allocation2 + $0x3a] sm:$0xff] }
  0x40   : > { %3104 = vmatmul.msk.bf16.gmra.mxu0 %vm591_vm0, %v758_v34  ;;  %480 = vst.msk [vmem:[#allocation2 + $0xf0] sm:$0x1] %vm473_vm2, %v3551_v53  ;;  %v756_v23 = vld [vmem:[#allocation2 + $0x131] sm:$0xff]  ;;  %v1313_v45 = vld [vmem:[#allocation2 + $0x40] sm:$0xff] }
  0x41   : > { %481 = vst.msk [vmem:[#allocation2 + $0x118] sm:$0x1] %vm473_vm2, %v3551_v53  ;;  %v673_v19 = vld [vmem:[#allocation2] sm:$0xff]  ;;  %v3818_v25 = vpack.c.bf16 %v756_v23, %v755_v22  ;;  %v675_v34 = vld [vmem:[#allocation2 + $0x10] sm:$0xff]  ;;  %v1312_v44 = vld [vmem:[#allocation2 + $0x38] sm:$0xff] }
  0x42   : > { %482 = vst.msk [vmem:[#allocation2 + $0x140] sm:$0x1] %vm473_vm2, %v3551_v53  ;;  %v705_v24 = vpack.c.bf16 %v674_v20, %v673_v19  ;;  %v1310_v36 = vld [vmem:[#allocation2 + $0x28] sm:$0xff]  ;;  %v706_v38 = vpack.c.bf16 %v676_v35, %v675_v34  ;;  %v1343_v46 = vpack.c.bf16 %v1313_v45, %v1312_v44  ;;  %v1321_v23 = vld [vmem:[#allocation2 + $0x90] sm:$0xff]  ;;  %v1325_v3 = vld [vmem:[#allocation2 + $0xb8] sm:$0xff] }
  0x43   : > { %3113 = vmatmul.msk.bf16.gmra.mxu2 %vm591_vm0, %v3741_v40  ;;  %483 = vst.msk [vmem:[#allocation2 + $0x168] sm:$0x1] %vm473_vm2, %v3551_v53  ;;  %v1342_v39 = vpack.c.bf16 %v1311_v37, %v1310_v36  ;;  %v1320_v22 = vld [vmem:[#allocation2 + $0x88] sm:$0xff] }
  0x44   : > { %484 = vst.msk [vmem:[#allocation2 + $0x21] sm:$0x1] %vm473_vm2, %v3551_v53  ;;  %v1318_v6 = vld [vmem:[#allocation2 + $0x78] sm:$0xff]  ;;  %v3911_v30 = vpack.c.bf16 %v1321_v23, %v1320_v22  ;;  %v1092_v35 = vld [vmem:[#allocation2 + $0xa2] sm:$0xff]  ;;  %v1093_v36 = vld [vmem:[#allocation2 + $0xaa] sm:$0xff]  ;;  %v3962_v22 = vpack.c.bf16 %v1325_v3, %v1324_v2 }
  0x45   : > { %485 = vst.msk [vmem:[#allocation2 + $0x49] sm:$0x1] %vm473_vm2, %v3551_v53  ;;  %v3883_v13 = vpack.c.bf16 %v1319_v7, %v1318_v6 }
  0x46   : > { %486 = vst.msk [vmem:[#allocation2 + $0x71] sm:$0x1] %vm473_vm2, %v3551_v53 }
  0x47   : > { %3110 = vmatmul.msk.bf16.gmra.mxu1 %vm591_vm0, %v3757_v52  ;;  %487 = vst.msk [vmem:[#allocation2 + $0x99] sm:$0x1] %vm473_vm2, %v3551_v53 }
  0x48   : > { %488 = vst.msk [vmem:[#allocation2 + $0xc1] sm:$0x1] %vm473_vm2, %v3551_v53 }
  0x49   : > { %3116 = vmatmul.msk.bf16.gmra.mxu3 %vm591_vm0, %v3763_v54  ;;  %489 = vst.msk [vmem:[#allocation2 + $0xe9] sm:$0x1] %vm473_vm2, %v3551_v53 }
  0x4a   : > { %490 = vst.msk [vmem:[#allocation2 + $0x111] sm:$0x1] %vm473_vm2, %v3551_v53 }
  0x4b   : > { %491 = vst.msk [vmem:[#allocation2 + $0x139] sm:$0x1] %vm473_vm2, %v3551_v53  ;;  %v1079_v17 = vld [vmem:[#allocation2 + $0x1a] sm:$0xff] }
  0x4c   : > { %492 = vst.msk [vmem:[#allocation2 + $0x161] sm:$0x1] %vm473_vm2, %v3551_v53  ;;  %v1109_v18 = vpack.c.bf16 %v1079_v17, %v1078_v16  ;;  %v1083_v42 = vld [vmem:[#allocation2 + $0x42] sm:$0xff]  ;;  %v1090_v16 = vld [vmem:[#allocation2 + $0x8a] sm:$0xff] }
  0x4d   : > { %493 = vst.msk [vmem:[#allocation2 + $0x189] sm:$0x1] %vm473_vm2, %v3551_v53  ;;  %v3833_v43 = vpack.c.bf16 %v1083_v42, %v1082_v41  ;;  %v1322_v41 = vld [vmem:[#allocation2 + $0xa0] sm:$0xff]  ;;  %v1323_v42 = vld [vmem:[#allocation2 + $0xa8] sm:$0xff] }
  0x4e   : > { %596 = vst.msk [vmem:[#allocation2 + $0x51] sm:$0xff] %vm591_vm0, %v562_v9  ;;  %v1091_v17 = vld [vmem:[#allocation2 + $0x92] sm:$0xff] }
  0x4f   : > { %597 = vst.msk [vmem:[#allocation2 + $0x59] sm:$0xff] %vm591_vm0, %v563_v11  ;;  %v3899_v20 = vpack.c.bf16 %v1091_v17, %v1090_v16 }
  0x50   : > { %3105 = vmatmul.msk.bf16.gmra.mxu0 %vm591_vm0, %v3776_v58 }
  0x53   : > { %3155 = vmatmul.msk.bf16.vlgmr.msrb.gmra.mxu2 %vm591_vm0, %v1108_v62 }
  0x55   : > { %v733_v26 = vld [vmem:[#allocation2 + $0x51] sm:$0xff] }
  0x56   : > { %v734_v27 = vld [vmem:[#allocation2 + $0x59] sm:$0xff]  ;;  %v1314_v51 = vld [vmem:[#allocation2 + $0x50] sm:$0xff] }
  0x57   : > { %3111 = vmatmul.msk.bf16.gmra.mxu1 %vm591_vm0, %v3797_v8  ;;  %v3823_v29 = vpack.c.bf16 %v734_v27, %v733_v26  ;;  %v1084_v47 = vld [vmem:[#allocation2 + $0x52] sm:$0xff]  ;;  %v1085_v48 = vld [vmem:[#allocation2 + $0x5a] sm:$0xff] }
  0x58   : > { %v3841_v50 = vpack.c.bf16 %v1085_v48, %v1084_v47  ;;  %v1315_v53 = vld [vmem:[#allocation2 + $0x58] sm:$0xff]  ;;  %v1316_v60 = vld [vmem:[#allocation2 + $0x60] sm:$0xff]  ;;  %v3939_v47 = vpack.c.bf16 %v1323_v42, %v1322_v41  ;;  %v1096_v41 = vld [vmem:[#allocation2 + $0xca] sm:$0xff] }
  0x59   : > { %3117 = vmatmul.msk.bf16.gmra.mxu3 %vm591_vm0, %v3802_v10  ;;  %v3846_v55 = vpack.c.bf16 %v1315_v53, %v1314_v51  ;;  %v3859_v63 = vpack.c.bf16 %v1317_v61, %v1316_v60  ;;  %v1094_v53 = vld [vmem:[#allocation2 + $0xb2] sm:$0xff] }
  0x5a   : > { %v1097_v42 = vld [vmem:[#allocation2 + $0xd2] sm:$0xff] }
  0x5b   : > { %v3973_v3 = vpack.c.bf16 %v1097_v42, %v1096_v41  ;;  %v1098_v42 = vld [vmem:[#allocation2 + $0xda] sm:$0xff] }
  0x5d   : > { %4570 = vst [vmem:[#allocation10_spill] sm:$0xff] %v3973_v3 }
  0x60   : > { %3106 = vmatmul.msk.bf16.gmra.mxu0 %vm591_vm0, %v760_v15 }
  0x63   : > { %3156 = vmatmul.msk.bf16.gmra.mxu2 %vm591_vm0, %v1109_v18 }
  0x67   : > { %3127 = vmatmul.msk.bf16.vlgmr.msrb.gmra.mxu1 %vm591_vm0, %v705_v24 }
  0x69   : > { %3118 = vmatmul.msk.bf16.gmra.mxu3 %vm591_vm0, %v3818_v25 }
  0x70   : > { %3107 = vmatmul.msk.bf16.gmra.mxu0 %vm591_vm0, %v3823_v29 }
  0x73   : > { %3157 = vmatmul.msk.bf16.gmra.mxu2 %vm591_vm0, %v3825_v33 }
  0x77   : > { %3128 = vmatmul.msk.bf16.gmra.mxu1 %vm591_vm0, %v706_v38 }
  0x79   : > { %3183 = vmatmul.msk.bf16.vlgmr.msrb.gmra.mxu3 %vm591_vm0, %v1342_v39 }
  0x80   : > { %3211 = vmatmul.msk.bf16.vlgmr.msrb.gmra.mxu0 %vm591_vm0, %v3776_v58  ;;  %v1087_v58 = vld [vmem:[#allocation2 + $0x6a] sm:$0xff] }
  0x81   : > { %v3851_v59 = vpack.c.bf16 %v1087_v58, %v1086_v56  ;;  %v1095_v56 = vld [vmem:[#allocation2 + $0xba] sm:$0xff] }
  0x82   : > { %v3951_v61 = vpack.c.bf16 %v1095_v56, %v1094_v53 }
  0x83   : > { %3158 = vmatmul.msk.bf16.gmra.mxu2 %vm591_vm0, %v3833_v43 }
  0x84   : > { %4567 = vst [vmem:[#allocation7_spill] sm:$0xff] %v3951_v61 }
  0x87   : > { %3129 = vmatmul.msk.bf16.gmra.mxu1 %vm591_vm0, %v1342_v39  ;;  %v3927_v39 = vpack.c.bf16 %v1093_v36, %v1092_v35 }
  0x89   : > { %3184 = vmatmul.msk.bf16.gmra.mxu3 %vm591_vm0, %v1343_v46  ;;  %4564 = vst [vmem:[#allocation4_spill] sm:$0xff] %v3927_v39 }
  0x90   : > { %3212 = vmatmul.msk.bf16.gmra.mxu0 %vm591_vm0, %v760_v15 }
  0x93   : > { %3159 = vmatmul.msk.bf16.gmra.mxu2 %vm591_vm0, %v3841_v50 }
  0x97   : > { %3130 = vmatmul.msk.bf16.gmra.mxu1 %vm591_vm0, %v1343_v46 }
  0x99   : > { %3185 = vmatmul.msk.bf16.gmra.mxu3 %vm591_vm0, %v3846_v55 }
  0xa0   : > { %3213 = vmatmul.msk.bf16.gmra.mxu0 %vm591_vm0, %v3823_v29 }
  0xa3   : > { %3160 = vmatmul.msk.bf16.gmra.mxu2 %vm591_vm0, %v3851_v59 }
  0xa4   : > { %v3857_v62 = vpop.f32.mrf.mxu1 }
  0xa7   : > { %3131 = vmatmul.msk.bf16.gmra.mxu1 %vm591_vm0, %v3846_v55 }
  0xa9   : > { %3186 = vmatmul.msk.bf16.gmra.mxu3 %vm591_vm0, %v3859_v63 }
  0xac   : > { %v3865_v0 = vpop.f32.mrf.mxu3  ;;  %v3867_v1 = vpop.f32.mrf.mxu1 }
  0xad   : > { %v3869_v4 = vpop.f32.mrf.mxu0 }
  0xb0   : > { %3214 = vmatmul.msk.bf16.gmra.mxu0 %vm591_vm0, %v3694_v49 }
  0xb3   : > { %3161 = vmatmul.msk.bf16.gmra.mxu2 %vm591_vm0, %v3871_v5 }
  0xb4   : > { %v3877_v9 = vpop.f32.mrf.mxu3  ;;  %v3879_v11 = vpop.f32.mrf.mxu1 }
  0xb5   : > { %v3881_v12 = vpop.f32.mrf.mxu0 }
  0xb6   : > { %v3885_v14 = vpop.f32.mrf.mxu2 }
  0xb7   : > { %3132 = vmatmul.msk.bf16.gmra.mxu1 %vm591_vm0, %v3859_v63 }
  0xb9   : > { %3187 = vmatmul.msk.bf16.gmra.mxu3 %vm591_vm0, %v3883_v13 }
  0xbc   : > { %v3891_v49 = vpop.f32.mrf.mxu3  ;;  %v3893_v15 = vpop.f32.mrf.mxu1 }
  0xbd   : > { %v3895_v18 = vpop.f32.mrf.mxu0 }
  0xbe   : > { %v3897_v19 = vpop.f32.mrf.mxu2 }
  0xc0   : > { %3215 = vmatmul.msk.bf16.gmra.mxu0 %vm591_vm0, %v3725_v28 }
  0xc3   : > { %3162 = vmatmul.msk.bf16.gmra.mxu2 %vm591_vm0, %v3899_v20 }
  0xc4   : > { %v3905_v24 = vpop.f32.mrf.mxu3  ;;  %v3907_v26 = vpop.f32.mrf.mxu1 }
  0xc5   : > { %v3909_v27 = vpop.f32.mrf.mxu0 }
  0xc6   : > { %v3913_v32 = vpop.f32.mrf.mxu2 }
  0xc7   : > { %3133 = vmatmul.msk.bf16.gmra.mxu1 %vm591_vm0, %v3883_v13 }
  0xc9   : > { %3188 = vmatmul.msk.bf16.gmra.mxu3 %vm591_vm0, %v3911_v30 }
  0xcc   : > { %v3919_v28 = vpop.f32.mrf.mxu3  ;;  %v3921_v34 = vpop.f32.mrf.mxu1 }
  0xcd   : > { %4563 = vst [vmem:[#allocation3_spill] sm:$0xff] %v3919_v28  ;;  %v3923_v37 = vpop.f32.mrf.mxu0 }
  0xce   : > { %v3925_v38 = vpop.f32.mrf.mxu2 }
  0xd0   : > { %3216 = vmatmul.msk.bf16.gmra.mxu0 %vm591_vm0, %v3757_v52 }
  0xd3   : > { %3163 = vmatmul.msk.bf16.gmra.mxu2 %vm591_vm0, %v3927_v39 }
  0xd4   : > { %v3933_v44 = vpop.f32.mrf.mxu3  ;;  %v3935_v45 = vpop.f32.mrf.mxu1 }
  0xd5   : > { %4565 = vst [vmem:[#allocation5_spill] sm:$0xff] %v3933_v44  ;;  %v3937_v46 = vpop.f32.mrf.mxu0 }
  0xd6   : > { %v1198_v48 = vpop.f32.mrf.mxu2 }
  0xd7   : > { %3134 = vmatmul.msk.bf16.gmra.mxu1 %vm591_vm0, %v3911_v30 }
  0xd9   : > { %3189 = vmatmul.msk.bf16.gmra.mxu3 %vm591_vm0, %v3939_v47 }
  0xdc   : > { %v3945_v52 = vpop.f32.mrf.mxu3  ;;  %v3947_v51 = vpop.f32.mrf.mxu1 }
  0xdd   : > { %4566 = vst [vmem:[#allocation6_spill] sm:$0xff] %v3945_v52  ;;  %v3949_v58 = vpop.f32.mrf.mxu0 }
  0xde   : > { %v1200_v60 = vpop.f32.mrf.mxu2 }
  0xe0   : > { %3217 = vmatmul.msk.bf16.gmra.mxu0 %vm591_vm0, %v3797_v8 }
  0xe3   : > { %3164 = vmatmul.msk.bf16.gmra.mxu2 %vm591_vm0, %v3951_v61 }
  0xe4   : > { %v3957_v6 = vpop.f32.mrf.mxu3  ;;  %v996_v7 = vpop.f32.mrf.mxu1 }
  0xe5   : > { %4568 = vst [vmem:[#allocation8_spill] sm:$0xff] %v3957_v6  ;;  %v3959_v16 = vpop.f32.mrf.mxu0  ;;  %v997_v17 = vadd.f32 %v996_v7, %v3869_v4  ;;  %v1327_v7 = vld [vmem:[#allocation2 + $0xd0] sm:$0xff] }
  0xe6   : > { %v1203_v23 = vpop.f32.mrf.mxu2 }
  0xe7   : > { %v1278_v35 = vadd.f32 %v1198_v48, %v997_v17  ;;  %3135 = vmatmul.msk.bf16.gmra.mxu1 %vm591_vm0, %v3939_v47  ;;  %v1326_v48 = vld [vmem:[#allocation2 + $0xc8] sm:$0xff] }
  0xe9   : > { %3190 = vmatmul.msk.bf16.gmra.mxu3 %vm591_vm0, %v3962_v22 }
  0xec   : > { %v3968_v8 = vpop.f32.mrf.mxu3  ;;  %v998_v36 = vpop.f32.mrf.mxu1 }
  0xed   : > { %4569 = vst [vmem:[#allocation9_spill] sm:$0xff] %v3968_v8  ;;  %v3970_v53 = vpop.f32.mrf.mxu0  ;;  %v999_v56 = vadd.f32 %v998_v36, %v3881_v12  ;;  %v3984_v12 = vpack.c.bf16 %v1327_v7, %v1326_v48 }
  0xee   : > { %v1205_v4 = vpop.f32.mrf.mxu2 }
  0xef   : > { %v1279_v2 = vadd.f32 %v1200_v60, %v999_v56  ;;  %v1099_v56 = vld [vmem:[#allocation2 + $0xe2] sm:$0xff] }
  0xf0   : > { %3218 = vmatmul.msk.bf16.gmra.mxu0 %vm591_vm0, %v3720_v21 }
  0xf3   : > { %3165 = vmatmul.msk.bf16.gmra.mxu2 %vm591_vm0, %v3973_v3 }
  0xf4   : > { %v3979_v17 = vpop.f32.mrf.mxu3  ;;  %v1001_v8 = vpop.f32.mrf.mxu1 }
  0xf5   : > { %4571 = vst [vmem:[#allocation11_spill] sm:$0xff] %v3979_v17  ;;  %v3981_v61 = vpop.f32.mrf.mxu0  ;;  %v1002_v6 = vadd.f32 %v1001_v8, %v3895_v18  ;;  %v3991_v8 = vpack.c.bf16 %v1099_v56, %v1098_v42  ;;  %v1101_v42 = vld [vmem:[#allocation2 + $0xfa] sm:$0xff] }
  0xf6   : > { %v1208_v60 = vpop.f32.mrf.mxu2 }
  0xf7   : > { %v1280_v36 = vadd.f32 %v1203_v23, %v1002_v6  ;;  %3136 = vmatmul.msk.bf16.gmra.mxu1 %vm591_vm0, %v3962_v22  ;;  %4572 = vst [vmem:[#allocation12_spill] sm:$0xff] %v3991_v8  ;;  %v1328_v6 = vld [vmem:[#allocation2 + $0xd8] sm:$0xff]  ;;  %v1329_v23 = vld [vmem:[#allocation2 + $0xe0] sm:$0xff] }
  0xf9   : > { %3191 = vmatmul.msk.bf16.gmra.mxu3 %vm591_vm0, %v3984_v12 }
  0xfc   : > { %v1432_v21 = vpop.f32.mrf.mxu3  ;;  %v1003_v41 = vpop.f32.mrf.mxu1 }
  0xfd   : > { %v1666_v3 = vpop.f32.mrf.mxu0  ;;  %v1512_v17 = vadd.f32 %v1432_v21, %v1278_v35  ;;  %v1004_v52 = vadd.f32 %v1003_v41, %v3909_v27  ;;  %v4000_v21 = vpack.c.bf16 %v1329_v23, %v1328_v6  ;;  %v1100_v41 = vld [vmem:[#allocation2 + $0xf2] sm:$0xff] }
  0xfe   : > { %v1210_v39 = vpop.f32.mrf.mxu2  ;;  %v4009_v23 = vpack.c.bf16 %v1101_v42, %v1100_v41 }
  0xff   : > { %v1281_v18 = vadd.f32 %v1205_v4, %v1004_v52  ;;  %v3993_v48 = vadd.f32 %v1666_v3, %v1512_v17 }
 0x100   : > { %3219 = vmatmul.msk.bf16.gmra.mxu0 %vm591_vm0, %v3741_v40  ;;  %4573 = vst [vmem:[#allocation13_spill] sm:$0xff] %v4009_v23 }
 0x103   : > { %3166 = vmatmul.msk.bf16.gmra.mxu2 %vm591_vm0, %v3991_v8 }
 0x104   : > { %v1434_v7 = vpop.f32.mrf.mxu3  ;;  %v1006_v44 = vpop.f32.mrf.mxu1 }
 0x105   : > { %v1668_v28 = vpop.f32.mrf.mxu0  ;;  %v1513_v35 = vadd.f32 %v1434_v7, %v1279_v2  ;;  %v1007_v27 = vadd.f32 %v1006_v44, %v3923_v37  ;;  %v1331_v7 = vld [vmem:[#allocation2 + $0xf8] sm:$0xff] }
 0x106   : > { %v1213_v52 = vpop.f32.mrf.mxu2 }
 0x107   : > { %v1282_v4 = vadd.f32 %v1208_v60, %v1007_v27  ;;  %3137 = vmatmul.msk.bf16.gmra.mxu1 %vm591_vm0, %v3984_v12  ;;  %v4004_v3 = vadd.f32 %v1668_v28, %v1513_v35  ;;  %v1330_v28 = vld [vmem:[#allocation2 + $0xf0] sm:$0xff] }
 0x109   : > { %3192 = vmatmul.msk.bf16.gmra.mxu3 %vm591_vm0, %v4000_v21 }
 0x10c   : > { %v1437_v40 = vpop.f32.mrf.mxu3  ;;  %v1008_v17 = vpop.f32.mrf.mxu1 }
 0x10d   : > { %v1671_v56 = vpop.f32.mrf.mxu0  ;;  %v1514_v2 = vadd.f32 %v1437_v40, %v1280_v36  ;;  %v1009_v37 = vadd.f32 %v1008_v17, %v3937_v46  ;;  %v4018_v40 = vpack.c.bf16 %v1331_v7, %v1330_v28  ;;  %v3360_v28 = vld [vmem:[%s4541_s3 + $0x78] sm:$0xff] }
 0x10e   : > { %v1215_v44 = vpop.f32.mrf.mxu2  ;;  %2366 = vmatpush.bf16.msra.mxu3 %v3360_v28  ;;  %v1105_v28 = vld [vmem:[#allocation2 + $0x122] sm:$0xff] }
 0x10f   : > { %v1283_v6 = vadd.f32 %v1210_v39, %v1009_v37  ;;  %v4011_v60 = vadd.f32 %v1671_v56, %v1514_v2  ;;  %v1103_v56 = vld [vmem:[#allocation2 + $0x10a] sm:$0xff] }
 0x110   : > { %3220 = vmatmul.msk.bf16.gmra.mxu0 %vm591_vm0, %v3702_v57  ;;  %v3358_v57 = vld [vmem:[%s4541_s3 + $0x68] sm:$0xff] }
 0x111   : > { %2132 = vmatpush.bf16.msra.mxu2 %v3358_v57 }
 0x113   : > { %3167 = vmatmul.msk.bf16.gmra.mxu2 %vm591_vm0, %v4009_v23  ;;  %v1335_v23 = vld [vmem:[#allocation2 + $0x120] sm:$0xff] }
 0x114   : > { %v1439_v35 = vpop.f32.mrf.mxu3  ;;  %v1011_v27 = vpop.f32.mrf.mxu1 }
 0x115   : > { %v1673_v8 = vpop.f32.mrf.mxu0  ;;  %v1515_v36 = vadd.f32 %v1439_v35, %v1281_v18  ;;  %v1012_v46 = vadd.f32 %v1011_v27, %v3949_v58  ;;  %v1102_v58 = vld [vmem:[#allocation2 + $0x102] sm:$0xff] }
 0x116   : > { %v1218_v39 = vpop.f32.mrf.mxu2  ;;  %v4036_v27 = vpack.c.bf16 %v1103_v56, %v1102_v58  ;;  %v3362_v56 = vld [vmem:[%s4541_s3 + $0x88] sm:$0xff] }
 0x117   : > { %v1284_v17 = vadd.f32 %v1213_v52, %v1012_v46  ;;  %3138 = vmatmul.msk.bf16.gmra.mxu1 %vm591_vm0, %v4000_v21  ;;  %v4025_v41 = vadd.f32 %v1673_v8, %v1515_v36  ;;  %v3356_v8 = vld [vmem:[%s4541_s3 + $0x58] sm:$0xff]  ;;  %2600 = vmatpush.bf16.msra.mxu0 %v3362_v56 }
 0x118   : > { %4574 = vst [vmem:[#allocation14_spill] sm:$0xff] %v4036_v27  ;;  %1897 = vmatpush.bf16.msra.mxu1 %v3356_v8 }
 0x119   : > { %3193 = vmatmul.msk.bf16.gmra.mxu3 %vm591_vm0, %v4018_v40 }
 0x11c   : > { %v1442_v18 = vpop.f32.mrf.mxu3  ;;  %v1013_v42 = vpop.f32.mrf.mxu1 }
 0x11d   : > { %v1676_v2 = vpop.f32.mrf.mxu0  ;;  %v1516_v37 = vadd.f32 %v1442_v18, %v1282_v4  ;;  %v1014_v52 = vadd.f32 %v1013_v42, %v3959_v16  ;;  %v1332_v16 = vld [vmem:[#allocation2 + $0x100] sm:$0xff]  ;;  %v1333_v4 = vld [vmem:[#allocation2 + $0x108] sm:$0xff] }
 0x11e   : > { %v1220_v7 = vpop.f32.mrf.mxu2  ;;  %v4045_v58 = vpack.c.bf16 %v1333_v4, %v1332_v16 }
 0x11f   : > { %v1285_v35 = vadd.f32 %v1215_v44, %v1014_v52  ;;  %v4038_v36 = vadd.f32 %v1676_v2, %v1516_v37  ;;  %v1104_v52 = vld [vmem:[#allocation2 + $0x11a] sm:$0xff] }
 0x120   : > { %3221 = vmatmul.msk.bf16.gmra.mxu0 %vm591_vm0, %v3731_v31 }
 0x121   : > { %4575 = vst [vmem:[#allocation15_spill] sm:$0xff] %v4038_v36  ;;  %v4058_v36 = vpack.c.bf16 %v1105_v28, %v1104_v52 }
 0x123   : > { %3168 = vmatmul.msk.bf16.gmra.mxu2 %vm591_vm0, %v4036_v27  ;;  %4577 = vst [vmem:[#allocation17_spill] sm:$0xff] %v4058_v36 }
 0x124   : > { %v1444_v46 = vpop.f32.mrf.mxu3  ;;  %v1016_v57 = vpop.f32.mrf.mxu1 }
 0x125   : > { %v1678_v18 = vpop.f32.mrf.mxu0  ;;  %v1517_v42 = vadd.f32 %v1444_v46, %v1283_v6  ;;  %v1017_v44 = vadd.f32 %v1016_v57, %v3970_v53  ;;  %v3456_v46 = vld [vmem:[%s3655_s25 + $0x70] sm:$0xff]  }
 0x126   : > { %v1223_v2 = vpop.f32.mrf.mxu2 }
 0x127   : > { %v1286_v31 = vadd.f32 %v1218_v39, %v1017_v44  ;;  %3139 = vmatmul.msk.bf16.gmra.mxu1 %vm591_vm0, %v4018_v40  ;;  %v4052_v37 = vadd.f32 %v1678_v18, %v1517_v42  ;;  %v3421_v39 = vunpack.c.l.bf16 %v3456_v46  ;;  %v3422_v44 = vunpack.c.h.bf16 %v3456_v46  ;;  %v1106_v46 = vld [vmem:[#allocation2 + $0x12a] sm:$0xff] }
 0x129   : > { %4576 = vst [vmem:[#allocation16_spill] sm:$0xff] %v4052_v37  ;;  %3194 = vmatmul.msk.bf16.gmra.mxu3 %vm591_vm0, %v4045_v58  ;;  %v586_v42 = vmax.f32 %v3421_v39, 0.0  ;;  %v587_v56 = vmax.f32 %v3422_v44, 0.0  ;;  %v1334_v37 = vld [vmem:[#allocation2 + $0x118] sm:$0xff] }
 0x12a   : > { %v4069_v52 = vpack.c.bf16 %v1335_v23, %v1334_v37  ;;  %v1107_v39 = vld [vmem:[#allocation2 + $0x132] sm:$0xff] }
 0x12b   : > { %620 = vst.msk [vmem:[#allocation2 + $0x141] sm:$0xff] %vm591_vm0, %v586_v42  ;;  %v3457_v23 = vld [vmem:[%s3655_s25 + $0x78] sm:$0xff]   ;;  %s3085_s25 = sshll.u32 %s4613_s16, 2 }
 0x12c   : > { %v1447_v6 = vpop.f32.mrf.mxu3  ;;  %v1018_v53 = vpop.f32.mrf.mxu1  ;;  %621 = vst.msk [vmem:[#allocation2 + $0x149] sm:$0xff] %vm591_vm0, %v587_v56  ;;  %v3425_v42 = vunpack.c.l.bf16 %v3457_v23  ;;  %s455_s21 = sadd.s32 %s3085_s25, %s3647_s19 }
 0x12d   : > { %v1681_v8 = vpop.f32.mrf.mxu0  ;;  %v1518_v16 = vadd.f32 %v1447_v6, %v1284_v17  ;;  %v1019_v4 = vadd.f32 %v1018_v53, %v3981_v61  ;;  %s3087_s22 = sshll.u32 %s455_s21, 2 }
 0x12e   : > { %v1225_v57 = vpop.f32.mrf.mxu2  ;;  %s4309_s24 = scalar_lea.vmem %s4540_s2, %s3087_s22  ;;  %s470_s22 = scalar_lea.vmem %s4546_s8, %s3090_s20 }
 0x12f   : > { %v1287_v27 = vadd.f32 %v1220_v7, %v1019_v4  ;;  %v4060_v18 = vadd.f32 %v1681_v8, %v1518_v16 }
 0x130   : > { %3222 = vmatmul.msk.bf16.gmra.mxu0 %vm591_vm0, %v3763_v54 }
 0x133   : > { %3169 = vmatmul.msk.bf16.gmra.mxu2 %vm591_vm0, %v4058_v36  ;;  %v1337_v36 = vld [vmem:[#allocation2 + $0x130] sm:$0xff] }
 0x134   : > { %v1449_v61 = vpop.f32.mrf.mxu3  ;;  %v1021_v17 = vpop.f32.mrf.mxu1 }
 0x135   : > { %v1683_v7 = vpop.f32.mrf.mxu0  ;;  %v1519_v6 = vadd.f32 %v1449_v61, %v1285_v35  ;;  %v1022_v53 = vadd.f32 %v1021_v17, %v3857_v62  ;;  %v4079_v61 = vpack.c.bf16 %v1107_v39, %v1106_v46  ;;  %v3355_v39 = vld [vmem:[%s4541_s3 + $0x50] sm:$0xff] }
 0x136   : > { %v1228_v54 = vpop.f32.mrf.mxu2  ;;  %1898 = vmatpush.bf16.msra.mxu1 %v3355_v39 }
 0x137   : > { %v1288_v28 = vadd.f32 %v1223_v2, %v1022_v53  ;;  %3140 = vmatmul.msk.bf16.gmra.mxu1 %vm591_vm0, %v4045_v58  ;;  %v4073_v8 = vadd.f32 %v1683_v7, %v1519_v6  ;;  %v3426_v2 = vunpack.c.h.bf16 %v3457_v23  ;;  %v588_v7 = vmax.f32 %v3425_v42, 0.0  ;;  %v1336_v53 = vld [vmem:[#allocation2 + $0x128] sm:$0xff] }
 0x138   : > { %v4093_v46 = vpack.c.bf16 %v1337_v36, %v1336_v53  ;;  %v1339_v53 = vld [vmem:[#allocation2 + $0x148] sm:$0xff] }
 0x139   : > { %3195 = vmatmul.msk.bf16.gmra.mxu3 %vm591_vm0, %v4069_v52  ;;  %v589_v6 = vmax.f32 %v3426_v2, 0.0  ;;  %622 = vst.msk [vmem:[#allocation2 + $0x151] sm:$0xff] %vm591_vm0, %v588_v7 }
 0x13b   : > { %623 = vst.msk [vmem:[#allocation2 + $0x159] sm:$0xff] %vm591_vm0, %v589_v6 }
 0x13c   : > { %v1452_v16 = vpop.f32.mrf.mxu3  ;;  %v1023_v4 = vpop.f32.mrf.mxu1 }
 0x13d   : > { %v1686_v44 = vpop.f32.mrf.mxu0  ;;  %v1520_v35 = vadd.f32 %v1452_v16, %v1286_v31  ;;  %v1024_v62 = vadd.f32 %v1023_v4, %v3867_v1  ;;  %v3357_v1 = vld [vmem:[%s4541_s3 + $0x60] sm:$0xff] }
 0x13e   : > { %v1230_v37 = vpop.f32.mrf.mxu2  ;;  %2133 = vmatpush.bf16.msra.mxu2 %v3357_v1 }
 0x13f   : > { %v1289_v56 = vadd.f32 %v1225_v57, %v1024_v62  ;;  %v4081_v17 = vadd.f32 %v1686_v44, %v1520_v35 }
 0x140   : > { %3223 = vmatmul.msk.bf16.gmra.mxu0 %vm591_vm0, %v3802_v10 }
 0x143   : > { %3170 = vmatmul.msk.bf16.gmra.mxu2 %vm591_vm0, %v4079_v61 }
 0x144   : > { %v1454_v31 = vpop.f32.mrf.mxu3  ;;  %v1026_v57 = vpop.f32.mrf.mxu1 }
 0x145   : > { %v1688_v16 = vpop.f32.mrf.mxu0  ;;  %v1521_v4 = vadd.f32 %v1454_v31, %v1287_v27  ;;  %v1027_v10 = vadd.f32 %v1026_v57, %v3879_v11 }
 0x146   : > { %v1233_v44 = vpop.f32.mrf.mxu2 }
 0x147   : > { %v1290_v35 = vadd.f32 %v1228_v54, %v1027_v10  ;;  %3141 = vmatmul.msk.bf16.gmra.mxu1 %vm591_vm0, %v4069_v52  ;;  %v4100_v62 = vadd.f32 %v1688_v16, %v1521_v4  ;;  %v1338_v54 = vld [vmem:[#allocation2 + $0x140] sm:$0xff] }
 0x148   : > { %v4112_v4 = vpack.c.bf16 %v1339_v53, %v1338_v54 }
 0x149   : > { %3196 = vmatmul.msk.bf16.gmra.mxu3 %vm591_vm0, %v4093_v46 }
 0x14c   : > { %v1457_v27 = vpop.f32.mrf.mxu3  ;;  %v1028_v11 = vpop.f32.mrf.mxu1 }
 0x14d   : > { %v1691_v36 = vpop.f32.mrf.mxu0  ;;  %v1522_v23 = vadd.f32 %v1457_v27, %v1288_v28  ;;  %v1029_v42 = vadd.f32 %v1028_v11, %v3893_v15  ;;  %v3359_v15 = vld [vmem:[%s4541_s3 + $0x70] sm:$0xff] }
 0x14e   : > { %v1235_v2 = vpop.f32.mrf.mxu2  ;;  %2367 = vmatpush.bf16.msra.mxu3 %v3359_v15 }
 0x14f   : > { %v1291_v7 = vadd.f32 %v1230_v37, %v1029_v42  ;;  %v4105_v6 = vadd.f32 %v1691_v36, %v1522_v23 }
 0x150   : > { %3224 = vmatmul.msk.bf16.gmra.mxu0 %vm591_vm0, %v3818_v25 }
 0x153   : > { %3267 = vmatmul.msk.bf16.vlgmr.msra.gmra.mxu2 %vm591_vm0, %v3846_v55  ;;  %v1572_v55 = vld [vmem:[#allocation2 + $0x141] sm:$0xff] }
 0x154   : > { %v1459_v1 = vpop.f32.mrf.mxu3  ;;  %v1031_v31 = vpop.f32.mrf.mxu1 }
 0x155   : > { %v1693_v57 = vpop.f32.mrf.mxu0  ;;  %v1523_v16 = vadd.f32 %v1459_v1, %v1289_v56  ;;  %v1032_v28 = vadd.f32 %v1031_v31, %v3907_v26  ;;  %v1573_v56 = vld [vmem:[#allocation2 + $0x149] sm:$0xff]  ;;  %v3361_v26 = vld [vmem:[%s4541_s3 + $0x80] sm:$0xff]  ;;  %v1341_v31 = vld [vmem:[#allocation2 + $0x158] sm:$0xff] }
 0x156   : > { %v1238_v37 = vpop.f32.mrf.mxu2  ;;  %v4126_v27 = vpack.c.bf16 %v1573_v56, %v1572_v55  ;;  %2601 = vmatpush.bf16.msra.mxu0 %v3361_v26  ;;  %v1340_v1 = vld [vmem:[#allocation2 + $0x150] sm:$0xff] }
 0x157   : > { %v1292_v10 = vadd.f32 %v1233_v44, %v1032_v28  ;;  %3142 = vmatmul.msk.bf16.gmra.mxu1 %vm591_vm0, %v4093_v46  ;;  %v4119_v25 = vadd.f32 %v1693_v57, %v1523_v16  ;;  %v1574_v26 = vld [vmem:[#allocation2 + $0x151] sm:$0xff] }
 0x159   : > { %3197 = vmatmul.msk.bf16.gmra.mxu3 %vm591_vm0, %v4112_v4 }
 0x15c   : > { %v1462_v39 = vpop.f32.mrf.mxu3  ;;  %v1033_v11 = vpop.f32.mrf.mxu1 }
 0x15d   : > { %v1696_v44 = vpop.f32.mrf.mxu0  ;;  %v1524_v36 = vadd.f32 %v1462_v39, %v1290_v35  ;;  %v1034_v23 = vadd.f32 %v1033_v11, %v3921_v34  ;;  %v4136_v34 = vpack.c.bf16 %v1341_v31, %v1340_v1 }
 0x15e   : > { %v1240_v42 = vpop.f32.mrf.mxu2 }
 0x15f   : > { %v1293_v54 = vadd.f32 %v1235_v2, %v1034_v23  ;;  %v4129_v53 = vadd.f32 %v1696_v44, %v1524_v36 }
 0x160   : > { %3225 = vmatmul.msk.bf16.gmra.mxu0 %vm591_vm0, %v4126_v27 }
 0x163   : > { %3268 = vmatmul.msk.bf16.gmra.mxu2 %vm591_vm0, %v3859_v63  ;;  %v1575_v63 = vld [vmem:[#allocation2 + $0x159] sm:$0xff] }
 0x164   : > { %v1464_v57 = vpop.f32.mrf.mxu3  ;;  %v1036_v16 = vpop.f32.mrf.mxu1  ;;  %v4144_v11 = vpack.c.bf16 %v1575_v63, %v1574_v26 }
 0x165   : > { %v1698_v28 = vpop.f32.mrf.mxu0  ;;  %v1525_v15 = vadd.f32 %v1464_v57, %v1291_v7  ;;  %v1037_v35 = vadd.f32 %v1036_v16, %v3935_v45 }
 0x166   : > { %v1243_v55 = vpop.f32.mrf.mxu2 }
 0x167   : > { %v1294_v2 = vadd.f32 %v1238_v37, %v1037_v35  ;;  %3239 = vmatmul.msk.bf16.vlgmr.msra.gmra.mxu1 %vm591_vm0, %v3825_v33  ;;  %v4140_v56 = vadd.f32 %v1698_v28, %v1525_v15 }
 0x169   : > { %3198 = vmatmul.msk.bf16.gmra.mxu3 %vm591_vm0, %v4136_v34 }
 0x16c   : > { %v1467_v39 = vpop.f32.mrf.mxu3  ;;  %v1038_v7 = vpop.f32.mrf.mxu1 }
 0x16d   : > { %v1701_v44 = vpop.f32.mrf.mxu0  ;;  %v1526_v45 = vadd.f32 %v1467_v39, %v1292_v10  ;;  %v1039_v36 = vadd.f32 %v1038_v7, %v3947_v51 }
 0x16e   : > { %v1245_v23 = vpop.f32.mrf.mxu2 }
 0x16f   : > { %v1295_v37 = vadd.f32 %v1240_v42, %v1039_v36  ;;  %v4147_v1 = vadd.f32 %v1701_v44, %v1526_v45 }
 0x170   : > { %3226 = vmatmul.msk.bf16.gmra.mxu0 %vm591_vm0, %v4144_v11 }
 0x173   : > { %3269 = vmatmul.msk.bf16.gmra.mxu2 %vm591_vm0, %v3883_v13 }
 0x174   : > { %v1469_v33 = vpop.f32.mrf.mxu3  ;;  %v1041_v31 = vpop.f32.mrf.mxu1 }
 0x175   : > { %v1703_v57 = vpop.f32.mrf.mxu0  ;;  %v1527_v16 = vadd.f32 %v1469_v33, %v1293_v54  ;;  %v1042_v28 = vadd.f32 %v1041_v31, %v3885_v14  ;;  %v2249_v14 = vld [vmem:[#allocation2 + $0x61] sm:$0xff] }
 0x176   : > { %v1248_v15 = vpop.f32.mrf.mxu2 }
 0x177   : > { %v1296_v10 = vadd.f32 %v1243_v55, %v1042_v28  ;;  %3240 = vmatmul.msk.bf16.gmra.mxu1 %vm591_vm0, %v3833_v43  ;;  %v4156_v51 = vadd.f32 %v1703_v57, %v1527_v16  ;;  %v2250_v43 = vld [vmem:[#allocation2 + $0x69] sm:$0xff] }
 0x178   : > { %v2280_v36 = vpack.c.bf16 %v2250_v43, %v2249_v14 }
 0x179   : > { %3295 = vmatmul.msk.bf16.vlgmr.msra.gmra.mxu3 %vm591_vm0, %v3823_v29 }
 0x17c   : > { %v1472_v42 = vpop.f32.mrf.mxu3  ;;  %v1043_v35 = vpop.f32.mrf.mxu1 }
 0x17d   : > { %v1706_v26 = vpop.f32.mrf.mxu0  ;;  %v1528_v13 = vadd.f32 %v1472_v42, %v1294_v2  ;;  %v1044_v63 = vadd.f32 %v1043_v35, %v3897_v19 }
 0x17e   : > { %v1250_v39 = vpop.f32.mrf.mxu2 }
 0x17f   : > { %v1297_v54 = vadd.f32 %v1245_v23, %v1044_v63  ;;  %v4161_v7 = vadd.f32 %v1706_v26, %v1528_v13 }
 0x180   : > { %3323 = vmatmul.msk.bf16.vlgmr.msra.gmra.mxu0 %vm591_vm0, %v3841_v50 }
 0x183   : > { %3270 = vmatmul.msk.bf16.gmra.mxu2 %vm591_vm0, %v3911_v30 }
 0x184   : > { %v1474_v55 = vpop.f32.mrf.mxu3  ;;  %v1046_v29 = vpop.f32.mrf.mxu1 }
 0x185   : > { %v1708_v44 = vpop.f32.mrf.mxu0  ;;  %v1529_v45 = vadd.f32 %v1474_v55, %v1295_v37  ;;  %v1047_v2 = vadd.f32 %v1046_v29, %v3913_v32  ;;  %v2251_v32 = vld [vmem:[#allocation2 + $0x79] sm:$0xff] }
 0x186   : > { %v1253_v19 = vpop.f32.mrf.mxu2 }
 0x187   : > { %v1298_v33 = vadd.f32 %v1248_v15, %v1047_v2  ;;  %3241 = vmatmul.msk.bf16.gmra.mxu1 %vm591_vm0, %v3841_v50  ;;  %v4170_v23 = vadd.f32 %v1708_v44, %v1529_v45  ;;  %v2252_v15 = vld [vmem:[#allocation2 + $0x81] sm:$0xff] }
 0x188   : > { %v2281_v14 = vpack.c.bf16 %v2252_v15, %v2251_v32 }
 0x189   : > { %3296 = vmatmul.msk.bf16.gmra.mxu3 %vm591_vm0, %v2280_v36 }
 0x18c   : > { %v1477_v31 = vpop.f32.mrf.mxu3  ;;  %v1048_v57 = vpop.f32.mrf.mxu1 }
 0x18d   : > { %v1711_v16 = vpop.f32.mrf.mxu0  ;;  %v1530_v30 = vadd.f32 %v1477_v31, %v1296_v10  ;;  %v1049_v28 = vadd.f32 %v1048_v57, %v3925_v38 }
 0x18e   : > { %v1255_v42 = vpop.f32.mrf.mxu2 }
 0x18f   : > { %v1299_v37 = vadd.f32 %v1250_v39, %v1049_v28  ;;  %v4174_v35 = vadd.f32 %v1711_v16, %v1530_v30 }
 0x190   : > { %3324 = vmatmul.msk.bf16.gmra.mxu0 %vm591_vm0, %v3851_v59 }
 0x193   : > { %3271 = vmatmul.msk.bf16.gmra.mxu2 %vm591_vm0, %v3939_v47 }
 0x194   : > { %v1479_v50 = vpop.f32.mrf.mxu3  ;;  %v1051_v26 = vpop.f32.mrf.mxu1 }
 0x195   : > { %v1713_v13 = vpop.f32.mrf.mxu0  ;;  %v1531_v63 = vadd.f32 %v1479_v50, %v1297_v54  ;;  %v1052_v10 = vadd.f32 %v1051_v26, %v3865_v0  ;;  %v2253_v0 = vld [vmem:[#allocation2 + $0x89] sm:$0xff] }
 0x196   : > { %v1258_v38 = vpop.f32.mrf.mxu2 }
 0x197   : > { %v1300_v43 = vadd.f32 %v1253_v19, %v1052_v10  ;;  %3242 = vmatmul.msk.bf16.gmra.mxu1 %vm591_vm0, %v3851_v59  ;;  %v4183_v39 = vadd.f32 %v1713_v13, %v1531_v63  ;;  %v2254_v19 = vld [vmem:[#allocation2 + $0x91] sm:$0xff]  ;;  %v2256_v10 = vld [vmem:[#allocation2 + $0xa9] sm:$0xff] }
 0x198   : > { %v2282_v30 = vpack.c.bf16 %v2254_v19, %v2253_v0 }
 0x199   : > { %3297 = vmatmul.msk.bf16.gmra.mxu3 %vm591_vm0, %v2281_v14 }
 0x19c   : > { %v1482_v55 = vpop.f32.mrf.mxu3  ;;  %v1053_v29 = vpop.f32.mrf.mxu1 }
 0x19d   : > { %v1716_v44 = vpop.f32.mrf.mxu0  ;;  %v1532_v47 = vadd.f32 %v1482_v55, %v1298_v33  ;;  %v1054_v45 = vadd.f32 %v1053_v29, %v3877_v9  ;;  %v4578_v29 = vld [vmem:[#allocation3_spill] sm:$0xff] }
 0x19e   : > { %v1260_v2 = vpop.f32.mrf.mxu2 }
 0x19f   : > { %v1301_v54 = vadd.f32 %v1255_v42, %v1054_v45  ;;  %v4187_v36 = vadd.f32 %v1716_v44, %v1532_v47 }
 0x1a0   : > { %3325 = vmatmul.msk.bf16.gmra.mxu0 %vm591_vm0, %v3871_v5 }
 0x1a3   : > { %3272 = vmatmul.msk.bf16.gmra.mxu2 %vm591_vm0, %v3962_v22 }
 0x1a4   : > { %v1484_v59 = vpop.f32.mrf.mxu3  ;;  %v1056_v31 = vpop.f32.mrf.mxu1 }
 0x1a5   : > { %v1718_v57 = vpop.f32.mrf.mxu0  ;;  %v1533_v16 = vadd.f32 %v1484_v59, %v1299_v37  ;;  %v1057_v33 = vadd.f32 %v1056_v31, %v3891_v49  ;;  %v2255_v49 = vld [vmem:[#allocation2 + $0xa1] sm:$0xff] }
 0x1a6   : > { %v1263_v9 = vpop.f32.mrf.mxu2  ;;  %v2283_v44 = vpack.c.bf16 %v2256_v10, %v2255_v49  ;;  %v4579_v59 = vld [vmem:[#allocation5_spill] sm:$0xff] }
 0x1a7   : > { %v1302_v28 = vadd.f32 %v1258_v38, %v1057_v33  ;;  %3243 = vmatmul.msk.bf16.gmra.mxu1 %vm591_vm0, %v3871_v5  ;;  %v4196_v42 = vadd.f32 %v1718_v57, %v1533_v16  ;;  %v4580_v33 = vld [vmem:[#allocation4_spill] sm:$0xff] }
 0x1a9   : > { %3298 = vmatmul.msk.bf16.gmra.mxu3 %vm591_vm0, %v2282_v30  ;;  %v2257_v30 = vld [vmem:[#allocation2 + $0xb1] sm:$0xff] }
 0x1ac   : > { %v1487_v32 = vpop.f32.mrf.mxu3  ;;  %v1058_v15 = vpop.f32.mrf.mxu1 }
 0x1ad   : > { %v1721_v50 = vpop.f32.mrf.mxu0  ;;  %v1534_v22 = vadd.f32 %v1487_v32, %v1300_v43  ;;  %v1059_v26 = vadd.f32 %v1058_v15, %v3905_v24 }
 0x1ae   : > { %v1265_v13 = vpop.f32.mrf.mxu2 }
 0x1af   : > { %v1303_v37 = vadd.f32 %v1260_v2, %v1059_v26  ;;  %v4200_v63 = vadd.f32 %v1721_v50, %v1534_v22  ;;  %v4581_v22 = vld [vmem:[#allocation6_spill] sm:$0xff] }
 0x1b0   : > { %3326 = vmatmul.msk.bf16.gmra.mxu0 %vm591_vm0, %v3899_v20 }
 0x1b3   : > { %3273 = vmatmul.msk.bf16.gmra.mxu2 %vm591_vm0, %v3984_v12 }
 0x1b4   : > { %v1489_v5 = vpop.f32.mrf.mxu3  ;;  %v1061_v14 = vpop.f32.mrf.mxu1 }
 0x1b5   : > { %v1723_v38 = vpop.f32.mrf.mxu0  ;;  %v1535_v55 = vadd.f32 %v1489_v5, %v1301_v54  ;;  %v1062_v43 = vadd.f32 %v1061_v14, %v4578_v29 }
 0x1b6   : > { %v1268_v24 = vpop.f32.mrf.mxu2 }
 0x1b7   : > { %v1304_v47 = vadd.f32 %v1263_v9, %v1062_v43  ;;  %3244 = vmatmul.msk.bf16.gmra.mxu1 %vm591_vm0, %v3899_v20  ;;  %v4209_v45 = vadd.f32 %v1723_v38, %v1535_v55  ;;  %v2258_v9 = vld [vmem:[#allocation2 + $0xb9] sm:$0xff] }
 0x1b8   : > { %v2284_v26 = vpack.c.bf16 %v2258_v9, %v2257_v30  ;;  %v4582_v55 = vld [vmem:[#allocation8_spill] sm:$0xff] }
 0x1b9   : > { %3299 = vmatmul.msk.bf16.gmra.mxu3 %vm591_vm0, %v2283_v44 }
 0x1bc   : > { %v1492_v2 = vpop.f32.mrf.mxu3  ;;  %v1063_v0 = vpop.f32.mrf.mxu1 }
 0x1bd   : > { %v1726_v19 = vpop.f32.mrf.mxu0  ;;  %v1536_v12 = vadd.f32 %v1492_v2, %v1302_v28  ;;  %v1064_v31 = vadd.f32 %v1063_v0, %v4579_v59  ;;  %v4583_v2 = vld [vmem:[#allocation7_spill] sm:$0xff] }
 0x1be   : > { %v1270_v57 = vpop.f32.mrf.mxu2  ;;  %v2260_v0 = vld [vmem:[#allocation2 + $0xd1] sm:$0xff] }
 0x1bf   : > { %v1305_v54 = vadd.f32 %v1265_v13, %v1064_v31  ;;  %v4213_v16 = vadd.f32 %v1726_v19, %v1536_v12 }
 0x1c0   : > { %3327 = vmatmul.msk.bf16.gmra.mxu0 %vm591_vm0, %v4580_v33 }
 0x1c3   : > { %3274 = vmatmul.msk.bf16.gmra.mxu2 %vm591_vm0, %v4000_v21 }
 0x1c4   : > { %v1494_v20 = vpop.f32.mrf.mxu3  ;;  %v1066_v32 = vpop.f32.mrf.mxu1 }
 0x1c5   : > { %v1728_v15 = vpop.f32.mrf.mxu0  ;;  %v1537_v50 = vadd.f32 %v1494_v20, %v1303_v37  ;;  %v1067_v28 = vadd.f32 %v1066_v32, %v4581_v22  ;;  %v4585_v22 = vld [vmem:[#allocation11_spill] sm:$0xff] }
 0x1c6   : > { %v1273_v49 = vpop.f32.mrf.mxu2 }
 0x1c7   : > { %v1306_v10 = vadd.f32 %v1268_v24, %v1067_v28  ;;  %3245 = vmatmul.msk.bf16.gmra.mxu1 %vm591_vm0, %v4580_v33  ;;  %v4222_v13 = vadd.f32 %v1728_v15, %v1537_v50  ;;  %v2259_v24 = vld [vmem:[#allocation2 + $0xc9] sm:$0xff]  ;;  %v4584_v33 = vld [vmem:[#allocation9_spill] sm:$0xff] }
 0x1c8   : > { %v2285_v30 = vpack.c.bf16 %v2260_v0, %v2259_v24 }
 0x1c9   : > { %3300 = vmatmul.msk.bf16.gmra.mxu3 %vm591_vm0, %v2284_v26 }
 0x1cc   : > { %v1497_v5 = vpop.f32.mrf.mxu3  ;;  %v1068_v14 = vpop.f32.mrf.mxu1 }
 0x1cd   : > { %v1731_v38 = vpop.f32.mrf.mxu0  ;;  %v1538_v21 = vadd.f32 %v1497_v5, %v1304_v47  ;;  %v1069_v29 = vadd.f32 %v1068_v14, %v4582_v55  ;;  %v4586_v14 = vld [vmem:[#allocation10_spill] sm:$0xff] }
 0x1ce   : > { %v1275_v43 = vpop.f32.mrf.mxu2 }
 0x1cf   : > { %v1307_v37 = vadd.f32 %v1270_v57, %v1069_v29  ;;  %v4226_v44 = vadd.f32 %v1731_v38, %v1538_v21  ;;  %v2262_v38 = vld [vmem:[#allocation2 + $0xe1] sm:$0xff] }
 0x1d0   : > { %3328 = vmatmul.msk.bf16.gmra.mxu0 %vm591_vm0, %v4583_v2 }
 0x1d3   : > { %3275 = vmatmul.msk.bf16.gmra.mxu2 %vm591_vm0, %v4018_v40 }
 0x1d4   : > { %v1499_v19 = vpop.f32.mrf.mxu3  ;;  %v1071_v12 = vpop.f32.mrf.mxu1 }
 0x1d5   : > { %v1733_v59 = vpop.f32.mrf.mxu0  ;;  %v1539_v31 = vadd.f32 %v1499_v19, %v1305_v54  ;;  %v1072_v47 = vadd.f32 %v1071_v12, %v4584_v33 }
 0x1d6   : > { %v2135_v9 = vpop.f32.mrf.mxu2 }
 0x1d7   : > { %v1308_v20 = vadd.f32 %v1273_v49, %v1072_v47  ;;  %3246 = vmatmul.msk.bf16.gmra.mxu1 %vm591_vm0, %v4583_v2  ;;  %v4235_v57 = vadd.f32 %v1733_v59, %v1539_v31  ;;  %v2261_v49 = vld [vmem:[#allocation2 + $0xd9] sm:$0xff] }
 0x1d8   : > { %v2286_v24 = vpack.c.bf16 %v2262_v38, %v2261_v49 }
 0x1d9   : > { %3301 = vmatmul.msk.bf16.gmra.mxu3 %vm591_vm0, %v2285_v30 }
 0x1dc   : > { %v1502_v32 = vpop.f32.mrf.mxu3  ;;  %v1073_v15 = vpop.f32.mrf.mxu1 }
 0x1dd   : > { %v1736_v50 = vpop.f32.mrf.mxu0  ;;  %v1540_v40 = vadd.f32 %v1502_v32, %v1306_v10  ;;  %v1074_v28 = vadd.f32 %v1073_v15, %v4585_v22  ;;  %v2264_v32 = vld [vmem:[#allocation2 + $0xf9] sm:$0xff] }
 0x1de   : > { %v2137_v26 = vpop.f32.mrf.mxu2 }
 0x1df   : > { %v1309_v54 = vadd.f32 %v1275_v43, %v1074_v28  ;;  %v4239_v5 = vadd.f32 %v1736_v50, %v1540_v40 }
 0x1e0   : > { %3329 = vmatmul.msk.bf16.gmra.mxu0 %vm591_vm0, %v4586_v14 }
 0x1e3   : > { %3276 = vmatmul.msk.bf16.gmra.mxu2 %vm591_vm0, %v4045_v58 }
 0x1e4   : > { %v1504_v21 = vpop.f32.mrf.mxu3  ;;  %v1900_v55 = vpop.f32.mrf.mxu1 }
 0x1e5   : > { %v1738_v29 = vpop.f32.mrf.mxu0  ;;  %v1541_v2 = vadd.f32 %v1504_v21, %v1307_v37  ;;  %v1980_v10 = vadd.f32 %v1900_v55, %v3993_v48  ;;  %v4587_v48 = vld [vmem:[#allocation12_spill] sm:$0xff] }
 0x1e6   : > { %v2140_v0 = vpop.f32.mrf.mxu2 }
 0x1e7   : > { %v2215_v19 = vadd.f32 %v2135_v9, %v1980_v10  ;;  %3247 = vmatmul.msk.bf16.gmra.mxu1 %vm591_vm0, %v4586_v14  ;;  %v4248_v43 = vadd.f32 %v1738_v29, %v1541_v2  ;;  %v2263_v9 = vld [vmem:[#allocation2 + $0xf1] sm:$0xff]  ;;  %v4588_v2 = vld [vmem:[#allocation13_spill] sm:$0xff] }
 0x1e8   : > { %v4275_v10 = vld [vmem:[%s4542_s4] ss:$0 sm:$0xff] }
 0x1e9   : > { %3302 = vmatmul.msk.bf16.gmra.mxu3 %vm591_vm0, %v2286_v24  ;;  %v2265_v24 = vld [vmem:[#allocation2 + $0x101] sm:$0xff] }
 0x1ec   : > { %v1507_v12 = vpop.f32.mrf.mxu3  ;;  %v1902_v59 = vpop.f32.mrf.mxu1 }
 0x1ed   : > { %v1741_v31 = vpop.f32.mrf.mxu0  ;;  %v1542_v58 = vadd.f32 %v1507_v12, %v1308_v20  ;;  %v1981_v33 = vadd.f32 %v1902_v59, %v4004_v3  ;;  %v2287_v3 = vpack.c.bf16 %v2264_v32, %v2263_v9 }
 0x1ee   : > { %v2142_v47 = vpop.f32.mrf.mxu2 }
 0x1ef   : > { %v2216_v37 = vadd.f32 %v2137_v26, %v1981_v33  ;;  %v4252_v30 = vadd.f32 %v1741_v31, %v1542_v58  ;;  %v4590_v58 = vld [vmem:[#allocation15_spill] sm:$0xff] }
 0x1f0   : > { %3330 = vmatmul.msk.bf16.gmra.mxu0 %vm591_vm0, %v4587_v48 }
 0x1f3   : > { %3277 = vmatmul.msk.bf16.gmra.mxu2 %vm591_vm0, %v4069_v52 }
 0x1f4   : > { %v1509_v15 = vpop.f32.mrf.mxu3  ;;  %v1905_v50 = vpop.f32.mrf.mxu1 }
 0x1f5   : > { %v1743_v40 = vpop.f32.mrf.mxu0  ;;  %v1543_v22 = vadd.f32 %v1509_v15, %v1309_v54  ;;  %v1982_v20 = vadd.f32 %v1905_v50, %v4011_v60 }
 0x1f6   : > { %v2145_v28 = vpop.f32.mrf.mxu2 }
 0x1f7   : > { %v2217_v26 = vadd.f32 %v2140_v0, %v1982_v20  ;;  %3248 = vmatmul.msk.bf16.gmra.mxu1 %vm591_vm0, %v4587_v48  ;;  %v4261_v14 = vadd.f32 %v1743_v40, %v1543_v22  ;;  %v4286_v48 = vld [vmem:[%s4543_s5] ss:$0 sm:$0xff] }
 0x1f9   : > { %3303 = vmatmul.msk.bf16.gmra.mxu3 %vm591_vm0, %v2287_v3 }
 0x1fc   : > { %v2369_v49 = vpop.f32.mrf.mxu3  ;;  %v1907_v38 = vpop.f32.mrf.mxu1 }
 0x1fd   : > { %v2603_v52 = vpop.f32.mrf.mxu0  ;;  %v2449_v21 = vadd.f32 %v2369_v49, %v2215_v19  ;;  %v1983_v55 = vadd.f32 %v1907_v38, %v4025_v41  ;;  %v2266_v41 = vld [vmem:[#allocation2 + $0x109] sm:$0xff] }
 0x1fe   : > { %v2147_v54 = vpop.f32.mrf.mxu2 }
 0x1ff   : > { %v2683_v29 = vadd.f32 %v2603_v52, %v2449_v21  ;;  %v2218_v60 = vadd.f32 %v2142_v47, %v1983_v55  ;;  %v2288_v47 = vpack.c.bf16 %v2266_v41, %v2265_v24  ;;  %v4592_v24 = vld [vmem:[#allocation14_spill] sm:$0xff]  ;;  %v2267_v41 = vld [vmem:[#allocation2 + $0x119] sm:$0xff] }
 0x200   : > { %3331 = vmatmul.msk.bf16.gmra.mxu0 %vm591_vm0, %v4588_v2 }
 0x201   : > { %v2719_v12 = vmul.f32 %v4275_v10, %v2683_v29 }
 0x203   : > { %3278 = vmatmul.msk.bf16.gmra.mxu2 %vm591_vm0, %v4093_v46 }
 0x204   : > { %v2371_v0 = vpop.f32.mrf.mxu3  ;;  %v1910_v19 = vpop.f32.mrf.mxu1 }
 0x205   : > { %v2605_v59 = vpop.f32.mrf.mxu0  ;;  %v2450_v31 = vadd.f32 %v2371_v0, %v2216_v37  ;;  %v1984_v33 = vadd.f32 %v1910_v19, %v4590_v58  ;;  %v2755_v37 = vadd.f32 %v4286_v48, %v2719_v12  ;;  %v2268_v0 = vld [vmem:[#allocation2 + $0x121] sm:$0xff] }
 0x206   : > { %v2150_v9 = vpop.f32.mrf.mxu2 }
 0x207   : > { %v2684_v32 = vadd.f32 %v2605_v59, %v2450_v31  ;;  %v2219_v15 = vadd.f32 %v2145_v28, %v1984_v33  ;;  %3249 = vmatmul.msk.bf16.gmra.mxu1 %vm591_vm0, %v4588_v2  ;;  %v4591_v28 = vld [vmem:[#allocation16_spill] sm:$0xff]  ;;  %v2787_v38 = vmax.f32 %v2755_v37, 0.0 }
 0x209   : > { %v2720_v46 = vmul.f32 %v4275_v10, %v2684_v32  ;;  %3304 = vmatmul.msk.bf16.gmra.mxu3 %vm591_vm0, %v2288_v47 }
 0x20b   : > { %v2756_v50 = vadd.f32 %v4286_v48, %v2720_v46 }
 0x20c   : > { %v2374_v40 = vpop.f32.mrf.mxu3  ;;  %v1912_v22 = vpop.f32.mrf.mxu1 }
 0x20d   : > { %v2608_v20 = vpop.f32.mrf.mxu0  ;;  %v2451_v3 = vadd.f32 %v2374_v40, %v2217_v26  ;;  %v1985_v49 = vadd.f32 %v1912_v22, %v4591_v28  ;;  %v2788_v52 = vmax.f32 %v2756_v50, 0.0  ;;  %v662_v22 = vstv %s661_s26 }
 0x20e   : > { %v2152_v21 = vpop.f32.mrf.mxu2  ;;  %vm4319_vm3 = vcmp.eq.s32.totalorder %v662_v22, 1 }
 0x20f   : > { %v2685_v55 = vadd.f32 %v2608_v20, %v2451_v3  ;;  %v2220_v29 = vadd.f32 %v2147_v54, %v1985_v49  ;;  %v4298_v2 = vpack.c.bf16 %v2788_v52, %v2787_v38  ;;  %v2289_v54 = vpack.c.bf16 %v2268_v0, %v2267_v41 }
 0x210   : > { %3332 = vmatmul.msk.bf16.gmra.mxu0 %vm591_vm0, %v4592_v24 }
 0x211   : > { %v2721_v58 = vmul.f32 %v4275_v10, %v2685_v55 }
 0x213   : > { %3279 = vmatmul.msk.bf16.gmra.mxu2 %vm591_vm0, %v4112_v4  ;;  %v3436_v4 = vld [vmem:[%s4309_s24] sm:$0xff]   ;;  %v2757_v37 = vadd.f32 %v4286_v48, %v2721_v58 }
 0x214   : > { %v2376_v26 = vpop.f32.mrf.mxu3  ;;  %v1915_v19 = vpop.f32.mrf.mxu1  ;;  %v3438_v46 = vunpack.c.h.bf16 %v3436_v4 }
 0x215   : > { %v2610_v12 = vpop.f32.mrf.mxu0  ;;  %v2452_v59 = vadd.f32 %v2376_v26, %v2218_v60  ;;  %v1986_v31 = vadd.f32 %v1915_v19, %v4060_v18  ;;  %v3437_v18 = vunpack.c.l.bf16 %v3436_v4  ;;  %v2789_v0 = vmax.f32 %v2757_v37, 0.0 }
 0x216   : > { %v2155_v33 = vpop.f32.mrf.mxu2  ;;  %v657_v40 = vmax.f32 %v3438_v46, 0.0 }
 0x217   : > { %v2686_v47 = vadd.f32 %v2610_v12, %v2452_v59  ;;  %v2221_v32 = vadd.f32 %v2150_v9, %v1986_v31  ;;  %3250 = vmatmul.msk.bf16.gmra.mxu1 %vm591_vm0, %v4592_v24  ;;  %v656_v50 = vmax.f32 %v3437_v18, 0.0  ;;  %v4595_v59 = vld [vmem:[#allocation17_spill] sm:$0xff]  ;;  %v2270_v31 = vld [vmem:[#allocation2 + $0x131] sm:$0xff] }
 0x218   : > { %v665_v24 = vsel %vm4319_vm3, %v657_v40, 0.0  ;;  %v3459_v40 = vld [vmem:[%s4309_s24 + $0x8] sm:$0xff]  }
 0x219   : > { %v2722_v60 = vmul.f32 %v4275_v10, %v2686_v47  ;;  %3305 = vmatmul.msk.bf16.gmra.mxu3 %vm591_vm0, %v2289_v54  ;;  %v664_v55 = vsel %vm4319_vm3, %v656_v50, 0.0  ;;  %670 = vst.msk [vmem:[#allocation2 + $0x171] sm:$0xff] %vm591_vm0, %v665_v24 }
 0x21a   : > { %669 = vst.msk [vmem:[#allocation2 + $0x169] sm:$0xff] %vm591_vm0, %v664_v55 }
 0x21b   : > { %v2758_v20 = vadd.f32 %v4286_v48, %v2722_v60 }
 0x21c   : > { %v2379_v3 = vpop.f32.mrf.mxu3  ;;  %v1917_v9 = vpop.f32.mrf.mxu1 }
 0x21d   : > { %v2613_v49 = vpop.f32.mrf.mxu0  ;;  %v2453_v38 = vadd.f32 %v2379_v3, %v2219_v15  ;;  %v1987_v52 = vadd.f32 %v1917_v9, %v4073_v8  ;;  %v2790_v26 = vmax.f32 %v2758_v20, 0.0  ;;  %v2269_v15 = vld [vmem:[#allocation2 + $0x129] sm:$0xff]  ;;  %v3442_v20 = vunpack.c.h.bf16 %v3459_v40 }
 0x21e   : > { %v4328_v41 = vpop.f32.mrf.mxu2 }
 0x21f   : > { %v2687_v19 = vadd.f32 %v2613_v49, %v2453_v38  ;;  %v2222_v12 = vadd.f32 %v2152_v21, %v1987_v52  ;;  %v4334_v8 = vpack.c.bf16 %v2790_v26, %v2789_v0  ;;  %v2290_v21 = vpack.c.bf16 %v2270_v31, %v2269_v15 }
 0x220   : > { %3333 = vmatmul.msk.bf16.gmra.mxu0 %vm591_vm0, %v4595_v59  ;;  %v659_v3 = vmax.f32 %v3442_v20, 0.0 }
 0x221   : > { %v2723_v18 = vmul.f32 %v4275_v10, %v2687_v19  ;;  %v2041_v52 = vld [vmem:[#allocation2 + $0x168] sm:$0xff] }
 0x222   : > { %v667_v26 = vsel %vm4319_vm3, %v659_v3, 0.0 }
 0x223   : > { %3280 = vmatmul.msk.bf16.gmra.mxu2 %vm591_vm0, %v4136_v34  ;;  %v3441_v34 = vunpack.c.l.bf16 %v3459_v40  ;;  %672 = vst.msk [vmem:[#allocation2 + $0x181] sm:$0xff] %vm591_vm0, %v667_v26  ;;  %v2505_v40 = vld [vmem:[#allocation2 + $0x142] sm:$0xff] }
 0x224   : > { %v2381_v54 = vpop.f32.mrf.mxu3  ;;  %v1920_v58 = vpop.f32.mrf.mxu1 }
 0x225   : > { %v2615_v47 = vpop.f32.mrf.mxu0  ;;  %v2454_v4 = vadd.f32 %v2381_v54, %v2220_v29  ;;  %v1988_v60 = vadd.f32 %v1920_v58, %v4081_v17  ;;  %v2759_v29 = vadd.f32 %v4286_v48, %v2723_v18  ;;  %v658_v17 = vmax.f32 %v3441_v34, 0.0 }
 0x226   : > { %v4340_v46 = vpop.f32.mrf.mxu2 }
 0x227   : > { %v2688_v37 = vadd.f32 %v2615_v47, %v2454_v4  ;;  %v2223_v50 = vadd.f32 %v2155_v33, %v1988_v60  ;;  %3251 = vmatmul.msk.bf16.gmra.mxu1 %vm591_vm0, %v4595_v59  ;;  %v2042_v33 = vld [vmem:[#allocation2 + $0x170] sm:$0xff]  ;;  %v666_v0 = vsel %vm4319_vm3, %v658_v17, 0.0  ;;  %v2791_v59 = vmax.f32 %v2759_v29, 0.0 }
 0x228   : > { %671 = vst.msk [vmem:[#allocation2 + $0x179] sm:$0xff] %vm591_vm0, %v666_v0  ;;  %v2059_v54 = vpack.c.bf16 %v2042_v33, %v2041_v52 }
 0x229   : > { %v2724_v22 = vmul.f32 %v4275_v10, %v2688_v37  ;;  %3306 = vmatmul.msk.bf16.gmra.mxu3 %vm591_vm0, %v2290_v21 }
 0x22b   : > { %v2760_v9 = vadd.f32 %v4286_v48, %v2724_v22  ;;  %v2506_v22 = vld [vmem:[#allocation2 + $0x14a] sm:$0xff] }
 0x22c   : > { %v2384_v49 = vpop.f32.mrf.mxu3  ;;  %v1922_v38 = vpop.f32.mrf.mxu1  ;;  %v2525_v17 = vpack.c.bf16 %v2506_v22, %v2505_v40 }
 0x22d   : > { %v2618_v55 = vpop.f32.mrf.mxu0  ;;  %v2455_v24 = vadd.f32 %v2384_v49, %v2221_v32  ;;  %v2792_v15 = vmax.f32 %v2760_v9, 0.0 }
 0x22e   : > { %v4353_v19 = vpop.f32.mrf.mxu2 }
 0x22f   : > { %v2689_v31 = vadd.f32 %v2618_v55, %v2455_v24  ;;  %v4359_v32 = vpack.c.bf16 %v2792_v15, %v2791_v59  ;;  %v2043_v3 = vld [vmem:[#allocation2 + $0x178] sm:$0xff]  ;;  %v2044_v9 = vld [vmem:[#allocation2 + $0x180] sm:$0xff]  ;;  %v1989_v24 = vadd.f32 %v1922_v38, %v4100_v62 }
 0x230   : > { %3334 = vmatmul.msk.bf16.gmra.mxu0 %vm591_vm0, %v4079_v61  ;;  %v2060_v0 = vpack.c.bf16 %v2044_v9, %v2043_v3 }
 0x231   : > { %v2725_v47 = vmul.f32 %v4275_v10, %v2689_v31  ;;  %v2224_v59 = vadd.f32 %v4328_v41, %v1989_v24  ;;  %v2507_v41 = vld [vmem:[#allocation2 + $0x152] sm:$0xff] }
 0x233   : > { %3281 = vmatmul.msk.bf16.gmra.mxu2 %vm591_vm0, %v2059_v54  ;;  %v2761_v34 = vadd.f32 %v4286_v48, %v2725_v47 }
 0x234   : > { %v2386_v58 = vpop.f32.mrf.mxu3  ;;  %v1925_v28 = vpop.f32.mrf.mxu1 }
 0x235   : > { %v2620_v4 = vpop.f32.mrf.mxu0  ;;  %v2456_v60 = vadd.f32 %v2386_v58, %v2222_v12  ;;  %v2793_v33 = vmax.f32 %v2761_v34, 0.0  ;;  %v1990_v62 = vadd.f32 %v1925_v28, %v4105_v6 }
 0x236   : > { %v4363_v21 = vpop.f32.mrf.mxu2 }
 0x237   : > { %v2690_v18 = vadd.f32 %v2620_v4, %v2456_v60  ;;  %3252 = vmatmul.msk.bf16.gmra.mxu1 %vm591_vm0, %v4079_v61  ;;  %v2508_v60 = vld [vmem:[#allocation2 + $0x15a] sm:$0xff] }
 0x238   : > { %v2526_v34 = vpack.c.bf16 %v2508_v60, %v2507_v41 }
 0x239   : > { %v2726_v37 = vmul.f32 %v4275_v10, %v2690_v18  ;;  %3307 = vmatmul.msk.bf16.gmra.mxu3 %vm591_vm0, %v4126_v27 }
 0x23b   : > { %v2762_v20 = vadd.f32 %v4286_v48, %v2726_v37  ;;  %v2225_v37 = vadd.f32 %v4340_v46, %v1990_v62  ;;  %v2276_v46 = vld [vmem:[#allocation2 + $0x171] sm:$0xff] }
 0x23c   : > { %v2389_v29 = vpop.f32.mrf.mxu3  ;;  %v1927_v12 = vpop.f32.mrf.mxu1  ;;  %v2510_v62 = vld [vmem:[#allocation2 + $0x172] sm:$0xff] }
 0x23d   : > { %v2623_v49 = vpop.f32.mrf.mxu0  ;;  %v2457_v52 = vadd.f32 %v2389_v29, %v2223_v50  ;;  %v2794_v61 = vmax.f32 %v2762_v20, 0.0  ;;  %v1991_v9 = vadd.f32 %v1927_v12, %v4119_v25 }
 0x23e   : > { %v4372_v55 = vpop.f32.mrf.mxu2 }
 0x23f   : > { %v2691_v27 = vadd.f32 %v2623_v49, %v2457_v52  ;;  %v4375_v26 = vpack.c.bf16 %v2794_v61, %v2793_v33  ;;  %v2275_v52 = vld [vmem:[#allocation2 + $0x169] sm:$0xff]  ;;  %v2226_v33 = vadd.f32 %v4353_v19, %v1991_v9 }
 0x240   : > { %3335 = vmatmul.msk.bf16.gmra.mxu0 %vm591_vm0, %v2525_v17 }
 0x241   : > { %v2727_v50 = vmul.f32 %v4275_v10, %v2691_v27 }
 0x243   : > { %3282 = vmatmul.msk.bf16.gmra.mxu2 %vm591_vm0, %v2060_v0  ;;  %v2763_v18 = vadd.f32 %v4286_v48, %v2727_v50 }
 0x244   : > { %v2391_v15 = vpop.f32.mrf.mxu3  ;;  %v1930_v31 = vpop.f32.mrf.mxu1 }
 0x245   : > { %v2625_v54 = vpop.f32.mrf.mxu0  ;;  %v2458_v58 = vadd.f32 %v2391_v15, %v2224_v59  ;;  %v2795_v29 = vmax.f32 %v2763_v18, 0.0  ;;  %v2293_v15 = vpack.c.bf16 %v2276_v46, %v2275_v52 }
 0x246   : > { %v4381_v47 = vpop.f32.mrf.mxu2 }
 0x247   : > { %v2692_v38 = vadd.f32 %v2625_v54, %v2458_v58  ;;  %3253 = vmatmul.msk.bf16.gmra.mxu1 %vm591_vm0, %v2525_v17  ;;  %v1992_v54 = vadd.f32 %v1930_v31, %v4129_v53  ;;  %v2509_v58 = vld [vmem:[#allocation2 + $0x16a] sm:$0xff] }
 0x248   : > { %v2527_v60 = vpack.c.bf16 %v2510_v62, %v2509_v58 }
 0x249   : > { %v2728_v4 = vmul.f32 %v4275_v10, %v2692_v38  ;;  %3308 = vmatmul.msk.bf16.gmra.mxu3 %vm591_vm0, %v4144_v11  ;;  %v2227_v38 = vadd.f32 %v4363_v21, %v1992_v54  ;;  %v2511_v54 = vld [vmem:[#allocation2 + $0x17a] sm:$0xff] }
 0x24b   : > { %v2764_v40 = vadd.f32 %v4286_v48, %v2728_v4 }
 0x24c   : > { %v2394_v22 = vpop.f32.mrf.mxu3  ;;  %v1932_v20 = vpop.f32.mrf.mxu1 }
 0x24d   : > { %v2628_v6 = vpop.f32.mrf.mxu0  ;;  %v2459_v28 = vadd.f32 %v2394_v22, %v2225_v37  ;;  %v2796_v17 = vmax.f32 %v2764_v40, 0.0 }
 0x24e   : > { %v4391_v3 = vpop.f32.mrf.mxu2 }
 0x24f   : > { %v4394_v11 = vpack.c.bf16 %v2796_v17, %v2795_v29  ;;  %v2693_v49 = vadd.f32 %v2628_v6, %v2459_v28  ;;  %v2277_v29 = vld [vmem:[#allocation2 + $0x179] sm:$0xff]  ;;  %v2278_v17 = vld [vmem:[#allocation2 + $0x181] sm:$0xff] }
 0x250   : > { %3336 = vmatmul.msk.bf16.gmra.mxu0 %vm591_vm0, %v2526_v34 }
 0x251   : > { %v2729_v27 = vmul.f32 %v4275_v10, %v2693_v49 }
 0x253   : > { %v2765_v19 = vadd.f32 %v4286_v48, %v2729_v27  ;;  %v2294_v27 = vpack.c.bf16 %v2278_v17, %v2277_v29 }
 0x254   : > { %v2396_v61 = vpop.f32.mrf.mxu3  ;;  %v1935_v24 = vpop.f32.mrf.mxu1 }
 0x255   : > { %v2630_v0 = vpop.f32.mrf.mxu0  ;;  %v2460_v59 = vadd.f32 %v2396_v61, %v2226_v33  ;;  %v2797_v31 = vmax.f32 %v2765_v19, 0.0 }
 0x256   : > { %v2175_v50 = vpop.f32.mrf.mxu2 }
 0x257   : > { %v2694_v25 = vadd.f32 %v2630_v0, %v2460_v59  ;;  %3254 = vmatmul.msk.bf16.gmra.mxu1 %vm591_vm0, %v2526_v34  ;;  %v1993_v34 = vadd.f32 %v1932_v20, %v4140_v56  ;;  %v1994_v56 = vadd.f32 %v1935_v24, %v4147_v1 }
 0x259   : > { %v2730_v12 = vmul.f32 %v4275_v10, %v2694_v25  ;;  %3309 = vmatmul.msk.bf16.gmra.mxu3 %vm591_vm0, %v2293_v15  ;;  %v2228_v21 = vadd.f32 %v4372_v55, %v1993_v34  ;;  %v2512_v55 = vld [vmem:[#allocation2 + $0x182] sm:$0xff] }
 0x25b   : > { %v2766_v4 = vadd.f32 %v4286_v48, %v2730_v12  ;;  %v2229_v12 = vadd.f32 %v4381_v47, %v1994_v56 }
 0x25c   : > { %v2399_v41 = vpop.f32.mrf.mxu3  ;;  %v1937_v18 = vpop.f32.mrf.mxu1 }
 0x25d   : > { %v2633_v37 = vpop.f32.mrf.mxu0  ;;  %v2461_v53 = vadd.f32 %v2399_v41, %v2227_v38  ;;  %v2798_v40 = vmax.f32 %v2766_v4, 0.0  ;;  %v1995_v41 = vadd.f32 %v1937_v18, %v4156_v51 }
 0x25e   : > { %v2177_v22 = vpop.f32.mrf.mxu2 }
 0x25f   : > { %v4407_v6 = vpack.c.bf16 %v2798_v40, %v2797_v31  ;;  %v2695_v28 = vadd.f32 %v2633_v37, %v2461_v53  ;;  %v2230_v47 = vadd.f32 %v4391_v3, %v1995_v41 }
 0x260   : > { %3337 = vmatmul.msk.bf16.gmra.mxu0 %vm591_vm0, %v2527_v60 }
 0x261   : > { %v2731_v52 = vmul.f32 %v4275_v10, %v2695_v28 }
 0x263   : > { %v2767_v25 = vadd.f32 %v4286_v48, %v2731_v52 }
 0x264   : > { %v2401_v9 = vpop.f32.mrf.mxu3  ;;  %v1940_v49 = vpop.f32.mrf.mxu1 }
 0x265   : > { %v2635_v46 = vpop.f32.mrf.mxu0  ;;  %v2462_v33 = vadd.f32 %v2401_v9, %v2228_v21  ;;  %v1996_v61 = vadd.f32 %v1940_v49, %v4161_v7  ;;  %v2528_v7 = vpack.c.bf16 %v2512_v55, %v2511_v54  ;;  %v2799_v24 = vmax.f32 %v2767_v25, 0.0 }
 0x266   : > { %v2180_v0 = vpop.f32.mrf.mxu2 }
 0x267   : > { %v2696_v20 = vadd.f32 %v2635_v46, %v2462_v33  ;;  %v2231_v59 = vadd.f32 %v2175_v50, %v1996_v61 }
 0x269   : > { %v2732_v15 = vmul.f32 %v4275_v10, %v2696_v20  ;;  %3310 = vmatmul.msk.bf16.gmra.mxu3 %vm591_vm0, %v2294_v27 }
 0x26b   : > { %v2768_v58 = vadd.f32 %v4286_v48, %v2732_v15 }
 0x26c   : > { %v2404_v62 = vpop.f32.mrf.mxu3  ;;  %v1942_v19 = vpop.f32.mrf.mxu1 }
 0x26d   : > { %v2638_v38 = vpop.f32.mrf.mxu0  ;;  %v2463_v4 = vadd.f32 %v2404_v62, %v2229_v12  ;;  %v1997_v1 = vadd.f32 %v1942_v19, %v4170_v23  ;;  %v2800_v50 = vmax.f32 %v2768_v58, 0.0 }
 0x26e   : > { %v2182_v37 = vpop.f32.mrf.mxu2 }
 0x26f   : > { %v2232_v60 = vadd.f32 %v2177_v22, %v1997_v1  ;;  %v2826_v53 = vpack.c.bf16 %v2800_v50, %v2799_v24  ;;  %v2697_v31 = vadd.f32 %v2638_v38, %v2463_v4 }
 0x270   : > { %3338 = vmatmul.msk.bf16.gmra.mxu0 %vm591_vm0, %v2528_v7 }
 0x271   : > { %v2733_v28 = vmul.f32 %v4275_v10, %v2697_v31 }
 0x273   : > { %v2769_v51 = vadd.f32 %v4286_v48, %v2733_v28 }
 0x274   : > { %v2406_v40 = vpop.f32.mrf.mxu3  ;;  %v1945_v34 = vpop.f32.mrf.mxu1 }
 0x275   : > { %v2640_v29 = vpop.f32.mrf.mxu0  ;;  %v2464_v17 = vadd.f32 %v2406_v40, %v2230_v47  ;;  %v1998_v23 = vadd.f32 %v1945_v34, %v4174_v35  ;;  %v2801_v3 = vmax.f32 %v2769_v51, 0.0 }
 0x276   : > { %v2185_v22 = vpop.f32.mrf.mxu2 }
 0x277   : > { %v2698_v21 = vadd.f32 %v2640_v29, %v2464_v17  ;;  %v2233_v9 = vadd.f32 %v2180_v0, %v1998_v23 }
 0x279   : > { %v2734_v18 = vmul.f32 %v4275_v10, %v2698_v21 }
 0x27b   : > { %v2770_v49 = vadd.f32 %v4286_v48, %v2734_v18 }
 0x27c   : > { %v2409_v52 = vpop.f32.mrf.mxu3  ;;  %v1947_v46 = vpop.f32.mrf.mxu1 }
 0x27d   : > { %v2802_v33 = vmax.f32 %v2770_v49, 0.0  ;;  %v2643_v61 = vpop.f32.mrf.mxu0  ;;  %v2465_v27 = vadd.f32 %v2409_v52, %v2231_v59  ;;  %v1999_v56 = vadd.f32 %v1947_v46, %v4183_v39  ;;  %v2864_v39 = vsel %vm591_vm0, %v2826_v53, 0 }
 0x27e   : > { %v2187_v54 = vpop.f32.mrf.mxu2  ;;  %v2861_v53 = vsel %vm591_vm0, %v4407_v6, 0  ;;  %v2858_v52 = vsel %vm591_vm0, %v4394_v11, 0  ;;  %v2855_v11 = vsel %vm591_vm0, %v4375_v26, 0 }
 0x27f   : > { %v2699_v20 = vadd.f32 %v2643_v61, %v2465_v27  ;;  %v2234_v15 = vadd.f32 %v2182_v37, %v1999_v56  ;;  %v2827_v35 = vpack.c.bf16 %v2802_v33, %v2801_v3 }
 0x281   : > { %v2867_v0 = vsel %vm591_vm0, %v2827_v35, 0  ;;  %v2735_v12 = vmul.f32 %v4275_v10, %v2699_v20 }
 0x282   : > { %2893 = vmatpush.bf16.xpose.msrb.mxu1 %v2867_v0 }
 0x283   : > { %v2771_v4 = vadd.f32 %v4286_v48, %v2735_v12 }
 0x284   : > { %v2411_v55 = vpop.f32.mrf.mxu3  ;;  %v1950_v25 = vpop.f32.mrf.mxu1 }
 0x285   : > { %v2645_v58 = vpop.f32.mrf.mxu0  ;;  %v2466_v62 = vadd.f32 %v2411_v55, %v2232_v60  ;;  %v2000_v7 = vadd.f32 %v1950_v25, %v4187_v36  ;;  %v2803_v47 = vmax.f32 %v2771_v4, 0.0 }
 0x286   : > { %v2190_v60 = vpop.f32.mrf.mxu2 }
 0x287   : > { %v2700_v19 = vadd.f32 %v2645_v58, %v2466_v62  ;;  %v2235_v38 = vadd.f32 %v2185_v22, %v2000_v7 }
 0x289   : > { %v2736_v59 = vmul.f32 %v4275_v10, %v2700_v19 }
 0x28a   : > { %2894 = vmatpush.bf16.xpose.msrb.mxu1 %v2864_v39 }
 0x28b   : > { %v2772_v1 = vadd.f32 %v4286_v48, %v2736_v59  ;;  %v2852_v59 = vsel %vm591_vm0, %v4359_v32, 0  ;;  %v2849_v32 = vsel %vm591_vm0, %v4334_v8, 0 }
 0x28c   : > { %v2414_v24 = vpop.f32.mrf.mxu3  ;;  %v1952_v50 = vpop.f32.mrf.mxu1 }
 0x28d   : > { %v2648_v41 = vpop.f32.mrf.mxu0  ;;  %v2467_v37 = vadd.f32 %v2414_v24, %v2233_v9  ;;  %v2001_v31 = vadd.f32 %v1952_v50, %v4196_v42  ;;  %v2804_v36 = vmax.f32 %v2772_v1, 0.0 }
 0x28e   : > { %v2192_v22 = vpop.f32.mrf.mxu2 }
 0x28f   : > { %v2701_v40 = vadd.f32 %v2648_v41, %v2467_v37  ;;  %v2236_v34 = vadd.f32 %v2187_v54, %v2001_v31  ;;  %v4437_v28 = vpack.c.bf16 %v2804_v36, %v2803_v47 }
 0x291   : > { %v2737_v23 = vmul.f32 %v4275_v10, %v2701_v40 }
 0x292   : > { %2895 = vmatpush.bf16.xpose.msrb.mxu1 %v2861_v53 }
 0x293   : > { %v2773_v46 = vadd.f32 %v4286_v48, %v2737_v23 }
 0x294   : > { %v2416_v29 = vpop.f32.mrf.mxu3  ;;  %v1955_v17 = vpop.f32.mrf.mxu1 }
 0x295   : > { %v2650_v21 = vpop.f32.mrf.mxu0  ;;  %v2468_v51 = vadd.f32 %v2416_v29, %v2234_v15  ;;  %v2002_v9 = vadd.f32 %v1955_v17, %v4200_v63  ;;  %v2805_v63 = vmax.f32 %v2773_v46, 0.0 }
 0x296   : > { %v2195_v54 = vpop.f32.mrf.mxu2 }
 0x297   : > { %v2702_v42 = vadd.f32 %v2650_v21, %v2468_v51  ;;  %v2237_v18 = vadd.f32 %v2190_v60, %v2002_v9 }
 0x299   : > { %v2738_v49 = vmul.f32 %v4275_v10, %v2702_v42 }
 0x29a   : > { %2896 = vmatpush.bf16.xpose.msrb.mxu1 %v2858_v52 }
 0x29b   : > { %v2774_v6 = vadd.f32 %v4286_v48, %v2738_v49 }
 0x29c   : > { %v2419_v3 = vpop.f32.mrf.mxu3  ;;  %v1957_v33 = vpop.f32.mrf.mxu1 }
 0x29d   : > { %v2653_v61 = vpop.f32.mrf.mxu0  ;;  %v2469_v27 = vadd.f32 %v2419_v3, %v2235_v38  ;;  %v2003_v56 = vadd.f32 %v1957_v33, %v4209_v45  ;;  %v2806_v20 = vmax.f32 %v2774_v6, 0.0 }
 0x29e   : > { %v2197_v26 = vpop.f32.mrf.mxu2 }
 0x29f   : > { %v2703_v15 = vadd.f32 %v2653_v61, %v2469_v27  ;;  %v2238_v35 = vadd.f32 %v2192_v22, %v2003_v56  ;;  %v4449_v0 = vpack.c.bf16 %v2806_v20, %v2805_v63 }
 0x2a1   : > { %v2739_v12 = vmul.f32 %v4275_v10, %v2703_v15 }
 0x2a2   : > { %2897 = vmatpush.bf16.xpose.msrb.mxu1 %v2855_v11 }
 0x2a3   : > { %v2775_v39 = vadd.f32 %v4286_v48, %v2739_v12 }
 0x2a4   : > { %v2421_v55 = vpop.f32.mrf.mxu3  ;;  %v1960_v25 = vpop.f32.mrf.mxu1 }
 0x2a5   : > { %v2655_v58 = vpop.f32.mrf.mxu0  ;;  %v2470_v62 = vadd.f32 %v2421_v55, %v2236_v34  ;;  %v2004_v7 = vadd.f32 %v1960_v25, %v4213_v16  ;;  %v2807_v16 = vmax.f32 %v2775_v39, 0.0 }
 0x2a6   : > { %v2200_v52 = vpop.f32.mrf.mxu2 }
 0x2a7   : > { %v2704_v45 = vadd.f32 %v2655_v58, %v2470_v62  ;;  %v2239_v19 = vadd.f32 %v2195_v54, %v2004_v7 }
 0x2a9   : > { %v2740_v38 = vmul.f32 %v4275_v10, %v2704_v45 }
 0x2aa   : > { %2898 = vmatpush.bf16.xpose.msrb.mxu1 %v2852_v59 }
 0x2ab   : > { %v2776_v4 = vadd.f32 %v4286_v48, %v2740_v38 }
 0x2ac   : > { %v2424_v1 = vpop.f32.mrf.mxu3  ;;  %v1962_v24 = vpop.f32.mrf.mxu1 }
 0x2ad   : > { %v2658_v50 = vpop.f32.mrf.mxu0  ;;  %v2471_v41 = vadd.f32 %v2424_v1, %v2237_v18  ;;  %v2005_v37 = vadd.f32 %v1962_v24, %v4222_v13  ;;  %v2808_v31 = vmax.f32 %v2776_v4, 0.0  ;;  %v2846_v13 = vsel %vm591_vm0, %v4298_v2, 0 }
 0x2ae   : > { %v2202_v20 = vpop.f32.mrf.mxu2 }
 0x2af   : > { %v2705_v60 = vadd.f32 %v2658_v50, %v2471_v41  ;;  %v2240_v47 = vadd.f32 %v2197_v26, %v2005_v37  ;;  %v4461_v36 = vpack.c.bf16 %v2808_v31, %v2807_v16 }
 0x2b1   : > { %v2741_v34 = vmul.f32 %v4275_v10, %v2705_v60 }
 0x2b2   : > { %2899 = vmatpush.bf16.xpose.msrb.mxu1 %v2849_v32 }
 0x2b3   : > { %v2777_v21 = vadd.f32 %v4286_v48, %v2741_v34 }
 0x2b4   : > { %v2426_v40 = vpop.f32.mrf.mxu3  ;;  %v1965_v51 = vpop.f32.mrf.mxu1 }
 0x2b5   : > { %v2660_v53 = vpop.f32.mrf.mxu0  ;;  %v2472_v29 = vadd.f32 %v2426_v40, %v2238_v35  ;;  %v2809_v22 = vmax.f32 %v2777_v21, 0.0  ;;  %v2006_v56 = vadd.f32 %v1965_v51, %v4226_v44 }
 0x2b6   : > { %v2205_v38 = vpop.f32.mrf.mxu2 }
 0x2b7   : > { %v2706_v17 = vadd.f32 %v2660_v53, %v2472_v29  ;;  %v2241_v11 = vadd.f32 %v2200_v52, %v2006_v56 }
 0x2b9   : > { %v2742_v23 = vmul.f32 %v4275_v10, %v2706_v17 }
 0x2ba   : > { %2900 = vmatpush.bf16.xpose.msrb.mxu1 %v2846_v13 }
 0x2bb   : > { %v2778_v9 = vadd.f32 %v4286_v48, %v2742_v23 }
 0x2bc   : > { %v2429_v42 = vpop.f32.mrf.mxu3  ;;  %v1967_v3 = vpop.f32.mrf.mxu1 }
 0x2bd   : > { %v2663_v8 = vpop.f32.mrf.mxu0  ;;  %v2473_v18 = vadd.f32 %v2429_v42, %v2239_v19  ;;  %v2810_v49 = vmax.f32 %v2778_v9, 0.0  ;;  %v2007_v45 = vadd.f32 %v1967_v3, %v4235_v57 }
 0x2be   : > { %v2207_v60 = vpop.f32.mrf.mxu2 }
 0x2bf   : > { %v2707_v46 = vadd.f32 %v2663_v8, %v2473_v18  ;;  %v4471_v6 = vpack.c.bf16 %v2810_v49, %v2809_v22  ;;  %v2242_v59 = vadd.f32 %v2202_v20, %v2007_v45 }
 0x2c1   : > { %v2743_v61 = vmul.f32 %v4275_v10, %v2707_v46 }
 0x2c3   : > { %v2779_v35 = vadd.f32 %v4286_v48, %v2743_v61 }
 0x2c4   : > { %v2431_v33 = vpop.f32.mrf.mxu3  ;;  %v1970_v7 = vpop.f32.mrf.mxu1 }
 0x2c5   : > { %v2665_v2 = vpop.f32.mrf.mxu0  ;;  %v2474_v27 = vadd.f32 %v2431_v33, %v2240_v47  ;;  %v2811_v58 = vmax.f32 %v2779_v35, 0.0  ;;  %v2008_v24 = vadd.f32 %v1970_v7, %v4239_v5 }
 0x2c6   : > { %v2210_v8 = vpop.f32.mrf.mxu2 }
 0x2c7   : > { %v2708_v63 = vadd.f32 %v2665_v2, %v2474_v27  ;;  %v2243_v31 = vadd.f32 %v2205_v38, %v2008_v24  ;;  %v2873_v24 = vsel %vm591_vm0, %v4449_v0, 0 }
 0x2c9   : > { %v2744_v15 = vmul.f32 %v4275_v10, %v2708_v63 }
 0x2cb   : > { %v2780_v54 = vadd.f32 %v4286_v48, %v2744_v15 }
 0x2cc   : > { %v2434_v55 = vpop.f32.mrf.mxu3  ;;  %v1972_v41 = vpop.f32.mrf.mxu1 }
 0x2cd   : > { %v2668_v25 = vpop.f32.mrf.mxu0  ;;  %v2475_v12 = vadd.f32 %v2434_v55, %v2241_v11  ;;  %v2812_v62 = vmax.f32 %v2780_v54, 0.0  ;;  %v2009_v29 = vadd.f32 %v1972_v41, %v4248_v43 }
 0x2ce   : > { %v2212_v15 = vpop.f32.mrf.mxu2 }
 0x2cf   : > { %v4479_v19 = vpack.c.bf16 %v2812_v62, %v2811_v58  ;;  %v2709_v44 = vadd.f32 %v2668_v25, %v2475_v12  ;;  %v2244_v13 = vadd.f32 %v2207_v60, %v2009_v29 }
 0x2d1   : > { %v2745_v26 = vmul.f32 %v4275_v10, %v2709_v44 }
 0x2d3   : > { %v2781_v16 = vadd.f32 %v4286_v48, %v2745_v26  ;;  %v2882_v26 = vsel %vm591_vm0, %v4479_v19, 0  ;;  %v2876_v19 = vsel %vm591_vm0, %v4461_v36, 0 }
 0x2d4   : > { %v2436_v39 = vpop.f32.mrf.mxu3  ;;  %v1975_v5 = vpop.f32.mrf.mxu1 }
 0x2d5   : > { %v2670_v4 = vpop.f32.mrf.mxu0  ;;  %v2476_v1 = vadd.f32 %v2436_v39, %v2242_v59  ;;  %v2813_v34 = vmax.f32 %v2781_v16, 0.0  ;;  %v2010_v18 = vadd.f32 %v1975_v5, %v4252_v30 }
 0x2d7   : > { %v2710_v50 = vadd.f32 %v2670_v4, %v2476_v1  ;;  %v2245_v46 = vadd.f32 %v2210_v8, %v2010_v18  ;;  %v2836_v4 = vld [vmem:[%s4545_s7] sm:$0xff]  ;;  %v3552_v1 = vmov 0  }
 0x2d8   : > { %3508 = vset.pattern.permute.xlu0 %v3552_v1 }
 0x2d9   : > { %v2746_v37 = vmul.f32 %v4275_v10, %v2710_v50  ;;  %2839 = vperm.xlu0 %3508, %v2836_v4  }
 0x2db   : > { %v2782_v57 = vadd.f32 %v4286_v48, %v2746_v37 }
 0x2dc   : > { %v2439_v47 = vpop.f32.mrf.mxu3  ;;  %v1977_v3 = vpop.f32.mrf.mxu1 }
 0x2dd   : > { %v2673_v32 = vpop.f32.mrf.mxu0  ;;  %v2477_v40 = vadd.f32 %v2439_v47, %v2243_v31  ;;  %v2814_v53 = vmax.f32 %v2782_v57, 0.0  ;;  %v2011_v63 = vadd.f32 %v1977_v3, %v4261_v14 }
 0x2df   : > { %v2833_v17 = vpack.c.bf16 %v2814_v53, %v2813_v34  ;;  %v2711_v23 = vadd.f32 %v2673_v32, %v2477_v40  ;;  %v2246_v30 = vadd.f32 %v2212_v15, %v2011_v63 }
 0x2e1   : > { %v2747_v51 = vmul.f32 %v4275_v10, %v2711_v23  ;;  %v2885_v39 = vsel %vm591_vm0, %v2833_v17, 0 }
 0x2e3   : > { %v2783_v52 = vadd.f32 %v4286_v48, %v2747_v51 }
 0x2e4   : > { %v2441_v21 = vpop.f32.mrf.mxu3 }
 0x2e5   : > { %v2675_v9 = vpop.f32.mrf.mxu0  ;;  %v2478_v42 = vadd.f32 %v2441_v21, %v2244_v13  ;;  %v2815_v27 = vmax.f32 %v2783_v52, 0.0 }
 0x2e7   : > { %v2712_v22 = vadd.f32 %v2675_v9, %v2478_v42 }
 0x2e9   : > { %v2748_v49 = vmul.f32 %v4275_v10, %v2712_v22 }
 0x2eb   : > { %v2784_v43 = vadd.f32 %v4286_v48, %v2748_v49 }
 0x2ec   : > { %v2444_v33 = vpop.f32.mrf.mxu3 }
 0x2ed   : > { %v2678_v61 = vpop.f32.mrf.mxu0  ;;  %v2479_v2 = vadd.f32 %v2444_v33, %v2245_v46  ;;  %v2816_v56 = vmax.f32 %v2784_v43, 0.0 }
 0x2ef   : > { %v2834_v20 = vpack.c.bf16 %v2816_v56, %v2815_v27  ;;  %v2713_v35 = vadd.f32 %v2678_v61, %v2479_v2 }
 0x2f1   : > { %v2749_v54 = vmul.f32 %v4275_v10, %v2713_v35  ;;  %v2888_v59 = vsel %vm591_vm0, %v2834_v20, 0 }
 0x2f3   : > { %v2785_v58 = vadd.f32 %v4286_v48, %v2749_v54 }
 0x2f4   : > { %v2446_v11 = vpop.f32.mrf.mxu3 }
 0x2f5   : > { %v2480_v55 = vadd.f32 %v2446_v11, %v2246_v30  ;;  %v2680_v25 = vpop.f32.mrf.mxu0  ;;  %v2817_v45 = vmax.f32 %v2785_v58, 0.0 }
 0x2f7   : > { %v2714_v12 = vadd.f32 %v2680_v25, %v2480_v55 }
 0x2f9   : > { %v2750_v62 = vmul.f32 %v4275_v10, %v2714_v12  ;;  %v2819_v10 = vld [vmem:[%s4544_s6] sm:$0xf] }
 0x2fa   : > { %3339 = vmatmul.msk.bf16.vlgmr.msrb.gmra.mxu1 %vm591_vm0, %v2819_v10 }
 0x2fb   : > { %v2786_v7 = vadd.f32 %v4286_v48, %v2750_v62  ;;  %v2879_v48 = vsel %vm591_vm0, %v4471_v6, 0  ;;  %v2870_v6 = vsel %vm591_vm0, %v4437_v28, 0 }
 0x2fd   : > { %v2818_v44 = vmax.f32 %v2786_v7, 0.0 }
 0x2ff   : > { %v2835_v38 = vpack.c.bf16 %v2818_v44, %v2817_v45 }
 0x301   : > { %v2891_v14 = vsel %vm591_vm0, %v2835_v38, 0 }
 0x302   : > { %2906 = vmatpush.bf16.xpose.msrb.mxu2 %v2891_v14 }
 0x30a   : > { %2907 = vmatpush.bf16.xpose.msrb.mxu2 %v2888_v59 }
 0x312   : > { %2908 = vmatpush.bf16.xpose.msrb.mxu2 %v2885_v39 }
 0x31a   : > { %2909 = vmatpush.bf16.xpose.msrb.mxu2 %v2882_v26 }
 0x322   : > { %2910 = vmatpush.bf16.xpose.msrb.mxu2 %v2879_v48 }
 0x32a   : > { %2911 = vmatpush.bf16.xpose.msrb.mxu2 %v2876_v19 }
 0x332   : > { %2912 = vmatpush.bf16.xpose.msrb.mxu2 %v2873_v24 }
 0x33a   : > { %2913 = vmatpush.bf16.xpose.msrb.mxu2 %v2870_v6 }
 0x341   : > { %3340 = vmatmul.msk.bf16.vlgmr.msrb.gmra.mxu2 %vm591_vm0, %v2819_v10 }
 0x34b   : > { %v2840_v36 = vpop.permute.xlu0 %2839 }
 0x377   : > { %v2902_v50 = vpop.f32.mrf.mxu1 }
 0x378   : > { %v2903_v0 = vadd.f32 %v2902_v50, %v2840_v36 }
 0x37a   : > { %2919 = vst [vmem:[%s470_s22] sm:$0xff] %v2903_v0 }
 0x37f   : > { %v2904_v41 = vpop.f32.mrf.mxu1 }
 0x3c4   : > { %v2915_v37 = vpop.f32.mrf.mxu2 }
 0x3c5   : > { %v2916_v28 = vadd.f32 %v2915_v37, %v2840_v36 }
 0x3c7   : > { %2920 = vst [vmem:[%s470_s22 + $0x8] sm:$0xff] %v2916_v28 }
 0x3cc   : > { %v2917_v16 = vpop.f32.mrf.mxu2 }
 0x3cd PF: > { %s18_s9 = sadd.s32 1, %s3549_s9   ;;  %s4596_s27 = smov %s3541_s29 }
 0x3ce   : > { %p15_p13 = scmp.ge.s32.totalorder %s18_s9, 10   ;;  %s4597_s28 = smov %s3545_s30 }
 0x3cf   : > { %s4598_s29 = smov %s4601_s10  ;;  %s4599_s30 = smov %s4605_s11 }
 0x3d0   :  { %17 = sbr.rel (!%p15_p13) target bundleno = 3 (0x3), region = 99 }

</bundles_post_ra>
